<compile_context>
chip_gen: v5e
topology: v5e:2x2
jax: 0.10.0
libtpu: 0.0.40
codegen_flags: <defaults>
</compile_context>

<pallas_src>
import functools
import math

import jax
import jax.numpy as jnp
from jax import lax
from jax.experimental import pallas as pl
from jax.experimental.pallas import tpu as pltpu

# ----------------------------- config (scaled-down albert-base-v2) -----------
VOCAB = 100
MAX_POS = 16
TYPE_VOCAB = 2
EMB = 32          # ALBERT embedding size (128 in albert-base-v2)
HID = 64          # hidden size (768 in albert-base-v2)
HEADS = 4
DH = HID // HEADS
FFN = 128         # intermediate size (3072 in albert-base-v2)
LAYERS = 2        # 12 in albert-base-v2 (weights shared across layers)
NUM_LABELS = 2
LN_EPS = 1e-12


def _gelu_new(x):
    # HF "gelu_new" activation used by ALBERT (f32 vector math).
    return 0.5 * x * (1.0 + jnp.tanh(math.sqrt(2.0 / math.pi)
                                     * (x + 0.044715 * x * x * x)))


def _layer_norm(x, g, b):
    x = x.astype(jnp.float32)
    mu = jnp.mean(x, axis=-1, keepdims=True)
    var = jnp.mean(jnp.square(x - mu), axis=-1, keepdims=True)
    return (x - mu) * jax.lax.rsqrt(var + LN_EPS) * g + b


# ----------------------------- fused forward kernel --------------------------
def _fused_forward_kernel(
        emb_ref, mask_ref,
        emb_ln_g, emb_ln_b, emb_proj_w, emb_proj_b,
        qkv_w, qkv_b, o_w, o_b, attn_ln_g, attn_ln_b,
        ffn_w, ffn_b, ffn_out_w, ffn_out_b, ffn_ln_g, ffn_ln_b,
        pre_w, pre_b, cls_w, cls_b,
        out_ref, *, batch, seq):
    M = batch * seq
    scale = 1.0 / math.sqrt(DH)

    # ---- hoist all loop-invariant reads + broadcasts (used every layer) -----
    qkv_w_v = qkv_w[...]                                         # bf16 [HID,3H]
    qkv_b_v = jnp.broadcast_to(qkv_b[...], (M, 3 * HID))
    o_w_v = o_w[...]                                             # bf16 [HID,HID]
    o_b_v = jnp.broadcast_to(o_b[...], (M, HID))
    attn_g_v = jnp.broadcast_to(attn_ln_g[...], (M, HID))
    attn_b_v = jnp.broadcast_to(attn_ln_b[...], (M, HID))
    ffn_w_v = ffn_w[...]                                         # bf16 [HID,FFN]
    ffn_b_v = jnp.broadcast_to(ffn_b[...], (M, FFN))
    ffn_ow_v = ffn_out_w[...]                                    # bf16 [FFN,HID]
    ffn_ob_v = jnp.broadcast_to(ffn_out_b[...], (M, HID))
    ffn_g_v = jnp.broadcast_to(ffn_ln_g[...], (M, HID))
    ffn_bb_v = jnp.broadcast_to(ffn_ln_b[...], (M, HID))
    mask_b = mask_ref[...][:, None, :]                           # [B, 1, S]

    # ---- embeddings: LayerNorm + projection EMB -> HID (no zero residual) ---
    e = _layer_norm(emb_ref[...], emb_ln_g[...], emb_ln_b[...])
    h = jnp.dot(e.astype(jnp.bfloat16), emb_proj_w[...],
                preferred_element_type=jnp.float32) + emb_proj_b[...]

    # ---- ALBERT encoder: same weights reused LAYERS times (weight sharing) --
    def layer_body(_, h):
        # fused QKV projection -> lane-dense N = 3*HID output, bf16 MXU operands
        qkv = jnp.dot(h.astype(jnp.bfloat16), qkv_w_v,
                      preferred_element_type=jnp.float32) + qkv_b_v
        q = (qkv[:, 0:HID] * scale).reshape(batch, seq, HID)
        k = qkv[:, HID:2 * HID].reshape(batch, seq, HID)
        v = qkv[:, 2 * HID:3 * HID].reshape(batch, seq, HID)

        # batched attention: one 3-D einsum pair per head (B is the batch dim),
        # contexts kept in-register and merged with a single lane concat.
        ctx_heads = []
        for hh in range(HEADS):
            lanes = slice(hh * DH, (hh + 1) * DH)
            qh = q[:, :, lanes].astype(jnp.bfloat16)             # [B, S, DH]
            kh = k[:, :, lanes].astype(jnp.bfloat16)             # [B, S, DH]
            vh = v[:, :, lanes].astype(jnp.bfloat16)             # [B, S, DH]
            s = jnp.einsum('bqd,bkd->bqk', qh, kh,
                           preferred_element_type=jnp.float32)   # [B, S, S]
            s = s + mask_b
            s = s - jnp.max(s, axis=-1, keepdims=True)
            p = jnp.exp(s)
            p = p * pl.reciprocal(jnp.sum(p, axis=-1, keepdims=True),
                                  approx=True)
            ctx_heads.append(
                jnp.einsum('bqk,bkd->bqd', p.astype(jnp.bfloat16), vh,
                           preferred_element_type=jnp.float32))  # [B, S, DH]
        ctx = jnp.concatenate(ctx_heads, axis=-1).reshape(M, HID)

        attn_out = jnp.dot(ctx.astype(jnp.bfloat16), o_w_v,
                           preferred_element_type=jnp.float32) + o_b_v
        # TODO(synk): internal attention/FFN dropouts are identity
        # (albert-base-v2 uses p=0 / eval mode)
        h = _layer_norm(attn_out + h, attn_g_v, attn_b_v)

        f = jnp.dot(h.astype(jnp.bfloat16), ffn_w_v,
                    preferred_element_type=jnp.float32) + ffn_b_v
        f = _gelu_new(f)
        f = jnp.dot(f.astype(jnp.bfloat16), ffn_ow_v,
                    preferred_element_type=jnp.float32) + ffn_ob_v
        return _layer_norm(f + h, ffn_g_v, ffn_bb_v)

    h = lax.fori_loop(0, LAYERS, layer_body, h)

    # ---- classification head on the [CLS] rows ------------------------------
    pooler = h.reshape(batch, seq, HID)[:, 0, :]                 # [B, HID]
    ph = jnp.dot(pooler.astype(jnp.bfloat16), pre_w[...],
                 preferred_element_type=jnp.float32) + pre_b[...]
    ph = jnp.maximum(ph, 0.0)
    # TODO(synk): nn.Dropout(0.3) treated as identity (inference/eval mode)
    logits = jnp.dot(ph.astype(jnp.bfloat16), cls_w[...],
                     preferred_element_type=jnp.float32) + cls_b[...]
    out_ref[...] = logits.astype(out_ref.dtype)


# ----------------------------- parameters ------------------------------------
def init_params(key):
    ks = iter(jax.random.split(key, 32))

    def w(shape, scale=0.02):
        return jax.random.normal(next(ks), shape, jnp.float32) * scale

    params = {
        "word_emb": w((VOCAB, EMB)),
        "pos_emb": w((MAX_POS, EMB)),
        "type_emb": w((TYPE_VOCAB, EMB)),
        "emb_ln_g": jnp.ones((EMB,), jnp.float32),
        "emb_ln_b": jnp.zeros((EMB,), jnp.float32),
        "emb_proj_w": w((EMB, HID)),
        "emb_proj_b": jnp.zeros((HID,), jnp.float32),
        # single shared ALBERT layer (shared across LAYERS repeats)
        "layer": {
            "q_w": w((HID, HID)), "q_b": jnp.zeros((HID,), jnp.float32),
            "k_w": w((HID, HID)), "k_b": jnp.zeros((HID,), jnp.float32),
            "v_w": w((HID, HID)), "v_b": jnp.zeros((HID,), jnp.float32),
            "o_w": w((HID, HID)), "o_b": jnp.zeros((HID,), jnp.float32),
            "attn_ln_g": jnp.ones((HID,), jnp.float32),
            "attn_ln_b": jnp.zeros((HID,), jnp.float32),
            "ffn_w": w((HID, FFN)), "ffn_b": jnp.zeros((FFN,), jnp.float32),
            "ffn_out_w": w((FFN, HID)),
            "ffn_out_b": jnp.zeros((HID,), jnp.float32),
            "ffn_ln_g": jnp.ones((HID,), jnp.float32),
            "ffn_ln_b": jnp.zeros((HID,), jnp.float32),
        },
        "pre_w": w((HID, HID)), "pre_b": jnp.zeros((HID,), jnp.float32),
        "cls_w": w((HID, NUM_LABELS)),
        "cls_b": jnp.zeros((NUM_LABELS,), jnp.float32),
    }
    return params


# ----------------------------- forward ----------------------------------------
def albert_class_forward(params, input_ids, attention_mask, token_type_ids):
    B, S = input_ids.shape

    # --- embeddings gather (plain-JAX glue; everything else is in-kernel) ---
    we = jnp.take(params["word_emb"], input_ids, axis=0)           # [B,S,EMB]
    pe = params["pos_emb"][:S][None, :, :]                         # [1,S,EMB]
    te = jnp.take(params["type_emb"], token_type_ids, axis=0)      # [B,S,EMB]
    emb = (we + pe + te).reshape(B * S, EMB).astype(jnp.float32)

    # additive attention mask, [B, S] (HF convention: -10000 on masked slots)
    mask = (1.0 - attention_mask.astype(jnp.float32)) * -10000.0

    L = params["layer"]
    bf16 = jnp.bfloat16
    # fused QKV weight/bias (lane-dense N = 3*HID), bf16 MXU operands
    qkv_w = jnp.concatenate([L["q_w"], L["k_w"], L["v_w"]], axis=1).astype(bf16)
    qkv_b = jnp.concatenate([L["q_b"], L["k_b"], L["v_b"]], axis=0)  # [3H] f32

    args = [
        emb, mask,
        params["emb_ln_g"].reshape(1, EMB), params["emb_ln_b"].reshape(1, EMB),
        params["emb_proj_w"].astype(bf16), params["emb_proj_b"].reshape(1, HID),
        qkv_w, qkv_b.reshape(1, 3 * HID),
        L["o_w"].astype(bf16), L["o_b"].reshape(1, HID),
        L["attn_ln_g"].reshape(1, HID), L["attn_ln_b"].reshape(1, HID),
        L["ffn_w"].astype(bf16), L["ffn_b"].reshape(1, FFN),
        L["ffn_out_w"].astype(bf16), L["ffn_out_b"].reshape(1, HID),
        L["ffn_ln_g"].reshape(1, HID), L["ffn_ln_b"].reshape(1, HID),
        params["pre_w"].astype(bf16), params["pre_b"].reshape(1, HID),
        params["cls_w"].astype(bf16), params["cls_b"].reshape(1, NUM_LABELS),
    ]
    # every arg is 2-D; whole-array blocks, single grid point
    in_specs = [pl.BlockSpec(a.shape, lambda i: (0, 0)) for a in args]

    return pl.pallas_call(
        functools.partial(_fused_forward_kernel, batch=B, seq=S),
        out_shape=jax.ShapeDtypeStruct((B, NUM_LABELS), jnp.float32),
        grid=(1,),
        in_specs=in_specs,
        out_specs=pl.BlockSpec((B, NUM_LABELS), lambda i: (0, 0)),
        compiler_params=pltpu.CompilerParams(
            dimension_semantics=("arbitrary",)),
    )(*args)


# ----------------------------- main -------------------------------------------
if __name__ == "__main__":
    key = jax.random.PRNGKey(0)
    pkey, ikey = jax.random.split(key)
    params = init_params(pkey)

    B, S = 2, 8
    input_ids = jax.random.randint(ikey, (B, S), 0, VOCAB, dtype=jnp.int32)
    attention_mask = jnp.ones((B, S), jnp.int32).at[1, 6:].set(0)
    token_type_ids = jnp.zeros((B, S), jnp.int32)

    logits = albert_class_forward(params, input_ids, attention_mask,
                                  token_type_ids)
    logits = jax.block_until_ready(logits)
    assert logits.shape == (B, NUM_LABELS)
    assert bool(jnp.all(jnp.isfinite(logits)))
    print("KERNEL_OK")
</pallas_src>

<mosaic_0001>
module attributes {stable_mosaic.version = 11 : i64} {
  func.func @_fused_forward_kernel(%arg0: i32, %arg1: memref<16x32xf32, #tpu.memory_space<vmem>>, %arg2: memref<2x8xf32, #tpu.memory_space<vmem>>, %arg3: memref<1x32xf32, #tpu.memory_space<vmem>>, %arg4: memref<1x32xf32, #tpu.memory_space<vmem>>, %arg5: memref<32x64xbf16, #tpu.memory_space<vmem>>, %arg6: memref<1x64xf32, #tpu.memory_space<vmem>>, %arg7: memref<64x192xbf16, #tpu.memory_space<vmem>>, %arg8: memref<1x192xf32, #tpu.memory_space<vmem>>, %arg9: memref<64x64xbf16, #tpu.memory_space<vmem>>, %arg10: memref<1x64xf32, #tpu.memory_space<vmem>>, %arg11: memref<1x64xf32, #tpu.memory_space<vmem>>, %arg12: memref<1x64xf32, #tpu.memory_space<vmem>>, %arg13: memref<64x128xbf16, #tpu.memory_space<vmem>>, %arg14: memref<1x128xf32, #tpu.memory_space<vmem>>, %arg15: memref<128x64xbf16, #tpu.memory_space<vmem>>, %arg16: memref<1x64xf32, #tpu.memory_space<vmem>>, %arg17: memref<1x64xf32, #tpu.memory_space<vmem>>, %arg18: memref<1x64xf32, #tpu.memory_space<vmem>>, %arg19: memref<64x64xbf16, #tpu.memory_space<vmem>>, %arg20: memref<1x64xf32, #tpu.memory_space<vmem>>, %arg21: memref<64x2xbf16, #tpu.memory_space<vmem>>, %arg22: memref<1x2xf32, #tpu.memory_space<vmem>>, %arg23: memref<2x2xf32, #tpu.memory_space<vmem>>) attributes {dimension_semantics = [#tpu.dimension_semantics<arbitrary>], iteration_bounds = array<i64: 1>, scalar_prefetch = 0 : i64, scratch_operands = 0 : i64, tpu.core_type = #tpu.core_type<tc>, window_params = [{pipeline_mode = #tpu.pipeline_mode<synchronous>, transform_indices = @transform_0, window_bounds = array<i64: 16, 32>}, {pipeline_mode = #tpu.pipeline_mode<synchronous>, transform_indices = @transform_1, window_bounds = array<i64: 2, 8>}, {pipeline_mode = #tpu.pipeline_mode<synchronous>, transform_indices = @transform_2, window_bounds = array<i64: 1, 32>}, {pipeline_mode = #tpu.pipeline_mode<synchronous>, transform_indices = @transform_3, window_bounds = array<i64: 1, 32>}, {pipeline_mode = #tpu.pipeline_mode<synchronous>, transform_indices = @transform_4, window_bounds = array<i64: 32, 64>}, {pipeline_mode = #tpu.pipeline_mode<synchronous>, transform_indices = @transform_5, window_bounds = array<i64: 1, 64>}, {pipeline_mode = #tpu.pipeline_mode<synchronous>, transform_indices = @transform_6, window_bounds = array<i64: 64, 192>}, {pipeline_mode = #tpu.pipeline_mode<synchronous>, transform_indices = @transform_7, window_bounds = array<i64: 1, 192>}, {pipeline_mode = #tpu.pipeline_mode<synchronous>, transform_indices = @transform_8, window_bounds = array<i64: 64, 64>}, {pipeline_mode = #tpu.pipeline_mode<synchronous>, transform_indices = @transform_9, window_bounds = array<i64: 1, 64>}, {pipeline_mode = #tpu.pipeline_mode<synchronous>, transform_indices = @transform_10, window_bounds = array<i64: 1, 64>}, {pipeline_mode = #tpu.pipeline_mode<synchronous>, transform_indices = @transform_11, window_bounds = array<i64: 1, 64>}, {pipeline_mode = #tpu.pipeline_mode<synchronous>, transform_indices = @transform_12, window_bounds = array<i64: 64, 128>}, {pipeline_mode = #tpu.pipeline_mode<synchronous>, transform_indices = @transform_13, window_bounds = array<i64: 1, 128>}, {pipeline_mode = #tpu.pipeline_mode<synchronous>, transform_indices = @transform_14, window_bounds = array<i64: 128, 64>}, {pipeline_mode = #tpu.pipeline_mode<synchronous>, transform_indices = @transform_15, window_bounds = array<i64: 1, 64>}, {pipeline_mode = #tpu.pipeline_mode<synchronous>, transform_indices = @transform_16, window_bounds = array<i64: 1, 64>}, {pipeline_mode = #tpu.pipeline_mode<synchronous>, transform_indices = @transform_17, window_bounds = array<i64: 1, 64>}, {pipeline_mode = #tpu.pipeline_mode<synchronous>, transform_indices = @transform_18, window_bounds = array<i64: 64, 64>}, {pipeline_mode = #tpu.pipeline_mode<synchronous>, transform_indices = @transform_19, window_bounds = array<i64: 1, 64>}, {pipeline_mode = #tpu.pipeline_mode<synchronous>, transform_indices = @transform_20, window_bounds = array<i64: 64, 2>}, {pipeline_mode = #tpu.pipeline_mode<synchronous>, transform_indices = @transform_21, window_bounds = array<i64: 1, 2>}, {pipeline_mode = #tpu.pipeline_mode<synchronous>, transform_indices = @transform_22, window_bounds = array<i64: 2, 2>}]} {
    %c0 = arith.constant 0 : index
    %c0_0 = arith.constant 0 : index
    %0 = vector.load %arg7[%c0, %c0_0] : memref<64x192xbf16, #tpu.memory_space<vmem>>, vector<64x192xbf16>
    %c0_1 = arith.constant 0 : index
    %c0_2 = arith.constant 0 : index
    %1 = vector.load %arg8[%c0_1, %c0_2] : memref<1x192xf32, #tpu.memory_space<vmem>>, vector<1x192xf32>
    %2 = vector.shape_cast %1 : vector<1x192xf32> to vector<1x192xf32>
    %3 = vector.broadcast %2 : vector<1x192xf32> to vector<16x192xf32>
    %c0_3 = arith.constant 0 : index
    %c0_4 = arith.constant 0 : index
    %4 = vector.load %arg9[%c0_3, %c0_4] : memref<64x64xbf16, #tpu.memory_space<vmem>>, vector<64x64xbf16>
    %c0_5 = arith.constant 0 : index
    %c0_6 = arith.constant 0 : index
    %5 = vector.load %arg10[%c0_5, %c0_6] : memref<1x64xf32, #tpu.memory_space<vmem>>, vector<1x64xf32>
    %6 = vector.shape_cast %5 : vector<1x64xf32> to vector<1x64xf32>
    %7 = vector.broadcast %6 : vector<1x64xf32> to vector<16x64xf32>
    %c0_7 = arith.constant 0 : index
    %c0_8 = arith.constant 0 : index
    %8 = vector.load %arg11[%c0_7, %c0_8] : memref<1x64xf32, #tpu.memory_space<vmem>>, vector<1x64xf32>
    %9 = vector.shape_cast %8 : vector<1x64xf32> to vector<1x64xf32>
    %10 = vector.broadcast %9 : vector<1x64xf32> to vector<16x64xf32>
    %c0_9 = arith.constant 0 : index
    %c0_10 = arith.constant 0 : index
    %11 = vector.load %arg12[%c0_9, %c0_10] : memref<1x64xf32, #tpu.memory_space<vmem>>, vector<1x64xf32>
    %12 = vector.shape_cast %11 : vector<1x64xf32> to vector<1x64xf32>
    %13 = vector.broadcast %12 : vector<1x64xf32> to vector<16x64xf32>
    %c0_11 = arith.constant 0 : index
    %c0_12 = arith.constant 0 : index
    %14 = vector.load %arg13[%c0_11, %c0_12] : memref<64x128xbf16, #tpu.memory_space<vmem>>, vector<64x128xbf16>
    %c0_13 = arith.constant 0 : index
    %c0_14 = arith.constant 0 : index
    %15 = vector.load %arg14[%c0_13, %c0_14] : memref<1x128xf32, #tpu.memory_space<vmem>>, vector<1x128xf32>
    %16 = vector.shape_cast %15 : vector<1x128xf32> to vector<1x128xf32>
    %17 = vector.broadcast %16 : vector<1x128xf32> to vector<16x128xf32>
    %c0_15 = arith.constant 0 : index
    %c0_16 = arith.constant 0 : index
    %18 = vector.load %arg15[%c0_15, %c0_16] : memref<128x64xbf16, #tpu.memory_space<vmem>>, vector<128x64xbf16>
    %c0_17 = arith.constant 0 : index
    %c0_18 = arith.constant 0 : index
    %19 = vector.load %arg16[%c0_17, %c0_18] : memref<1x64xf32, #tpu.memory_space<vmem>>, vector<1x64xf32>
    %20 = vector.shape_cast %19 : vector<1x64xf32> to vector<1x64xf32>
    %21 = vector.broadcast %20 : vector<1x64xf32> to vector<16x64xf32>
    %c0_19 = arith.constant 0 : index
    %c0_20 = arith.constant 0 : index
    %22 = vector.load %arg17[%c0_19, %c0_20] : memref<1x64xf32, #tpu.memory_space<vmem>>, vector<1x64xf32>
    %23 = vector.shape_cast %22 : vector<1x64xf32> to vector<1x64xf32>
    %24 = vector.broadcast %23 : vector<1x64xf32> to vector<16x64xf32>
    %c0_21 = arith.constant 0 : index
    %c0_22 = arith.constant 0 : index
    %25 = vector.load %arg18[%c0_21, %c0_22] : memref<1x64xf32, #tpu.memory_space<vmem>>, vector<1x64xf32>
    %26 = vector.shape_cast %25 : vector<1x64xf32> to vector<1x64xf32>
    %27 = vector.broadcast %26 : vector<1x64xf32> to vector<16x64xf32>
    %c0_23 = arith.constant 0 : index
    %c0_24 = arith.constant 0 : index
    %28 = vector.load %arg2[%c0_23, %c0_24] : memref<2x8xf32, #tpu.memory_space<vmem>>, vector<2x8xf32>
    %29 = vector.shape_cast %28 : vector<2x8xf32> to vector<2x1x8xf32>
    %c0_25 = arith.constant 0 : index
    %c0_26 = arith.constant 0 : index
    %30 = vector.load %arg1[%c0_25, %c0_26] : memref<16x32xf32, #tpu.memory_space<vmem>>, vector<16x32xf32>
    %c0_27 = arith.constant 0 : index
    %c0_28 = arith.constant 0 : index
    %31 = vector.load %arg3[%c0_27, %c0_28] : memref<1x32xf32, #tpu.memory_space<vmem>>, vector<1x32xf32>
    %c0_29 = arith.constant 0 : index
    %c0_30 = arith.constant 0 : index
    %32 = vector.load %arg4[%c0_29, %c0_30] : memref<1x32xf32, #tpu.memory_space<vmem>>, vector<1x32xf32>
    %cst = arith.constant dense<0.000000e+00> : vector<16xf32>
    %33 = vector.multi_reduction <add>, %30, %cst [1] : vector<16x32xf32> to vector<16xf32>
    %34 = vector.shape_cast %33 : vector<16xf32> to vector<16x1xf32>
    %cst_31 = arith.constant 3.200000e+01 : f32
    %35 = vector.broadcast %cst_31 : f32 to vector<16x1xf32>
    %36 = arith.divf %34, %35 : vector<16x1xf32>
    %37 = vector.broadcast %36 : vector<16x1xf32> to vector<16x32xf32>
    %38 = arith.subf %30, %37 : vector<16x32xf32>
    %39 = arith.mulf %38, %38 : vector<16x32xf32>
    %cst_32 = arith.constant dense<0.000000e+00> : vector<16xf32>
    %40 = vector.multi_reduction <add>, %39, %cst_32 [1] : vector<16x32xf32> to vector<16xf32>
    %41 = vector.shape_cast %40 : vector<16xf32> to vector<16x1xf32>
    %cst_33 = arith.constant 3.200000e+01 : f32
    %42 = vector.broadcast %cst_33 : f32 to vector<16x1xf32>
    %43 = arith.divf %41, %42 : vector<16x1xf32>
    %44 = vector.broadcast %36 : vector<16x1xf32> to vector<16x32xf32>
    %45 = arith.subf %30, %44 : vector<16x32xf32>
    %cst_34 = arith.constant 9.99999996E-13 : f32
    %46 = vector.broadcast %cst_34 : f32 to vector<16x1xf32>
    %47 = arith.addf %43, %46 : vector<16x1xf32>
    %48 = math.rsqrt %47 : vector<16x1xf32>
    %49 = vector.broadcast %48 : vector<16x1xf32> to vector<16x32xf32>
    %50 = arith.mulf %45, %49 : vector<16x32xf32>
    %51 = vector.broadcast %31 : vector<1x32xf32> to vector<16x32xf32>
    %52 = arith.mulf %50, %51 : vector<16x32xf32>
    %53 = vector.broadcast %32 : vector<1x32xf32> to vector<16x32xf32>
    %54 = arith.addf %52, %53 : vector<16x32xf32>
    %55 = arith.truncf %54 : vector<16x32xf32> to vector<16x32xbf16>
    %c0_35 = arith.constant 0 : index
    %c0_36 = arith.constant 0 : index
    %56 = vector.load %arg5[%c0_35, %c0_36] : memref<32x64xbf16, #tpu.memory_space<vmem>>, vector<32x64xbf16>
    %cst_37 = arith.constant dense<0.000000e+00> : vector<16x64xf32>
    %57 = tpu.matmul %55, %56, %cst_37 {dimension_numbers = #tpu.dot_dimension_numbers<[1], [0], [0], [1], [0, 0, 1, 1], [], []>} : vector<16x32xbf16>, vector<32x64xbf16>, vector<16x64xf32> -> vector<16x64xf32>
    %c0_38 = arith.constant 0 : index
    %c0_39 = arith.constant 0 : index
    %58 = vector.load %arg6[%c0_38, %c0_39] : memref<1x64xf32, #tpu.memory_space<vmem>>, vector<1x64xf32>
    %59 = vector.broadcast %58 : vector<1x64xf32> to vector<16x64xf32>
    %60 = arith.addf %57, %59 : vector<16x64xf32>
    %c0_i32 = arith.constant 0 : i32
    %c2_i32 = arith.constant 2 : i32
    %61 = arith.addi %c0_i32, %c2_i32 : i32
    %c1_i32 = arith.constant 1 : i32
    %62 = scf.for %arg24 = %c0_i32 to %61 step %c1_i32 iter_args(%arg25 = %60) -> (vector<16x64xf32>)  : i32 {
      %81 = arith.truncf %arg25 : vector<16x64xf32> to vector<16x64xbf16>
      %cst_53 = arith.constant dense<0.000000e+00> : vector<16x192xf32>
      %82 = tpu.matmul %81, %0, %cst_53 {dimension_numbers = #tpu.dot_dimension_numbers<[1], [0], [0], [1], [0, 0, 1, 1], [], []>} : vector<16x64xbf16>, vector<64x192xbf16>, vector<16x192xf32> -> vector<16x192xf32>
      %83 = arith.addf %82, %3 : vector<16x192xf32>
      %84 = vector.extract_strided_slice %83 {offsets = [0, 0], sizes = [16, 64], strides = [1, 1]} : vector<16x192xf32> to vector<16x64xf32>
      %cst_54 = arith.constant 2.500000e-01 : f32
      %85 = vector.broadcast %cst_54 : f32 to vector<16x64xf32>
      %86 = arith.mulf %84, %85 : vector<16x64xf32>
      %87 = vector.shape_cast %86 : vector<16x64xf32> to vector<2x8x64xf32>
      %88 = vector.extract_strided_slice %83 {offsets = [0, 64], sizes = [16, 64], strides = [1, 1]} : vector<16x192xf32> to vector<16x64xf32>
      %89 = vector.shape_cast %88 : vector<16x64xf32> to vector<2x8x64xf32>
      %90 = vector.extract_strided_slice %83 {offsets = [0, 128], sizes = [16, 64], strides = [1, 1]} : vector<16x192xf32> to vector<16x64xf32>
      %91 = vector.shape_cast %90 : vector<16x64xf32> to vector<2x8x64xf32>
      %92 = vector.extract_strided_slice %87 {offsets = [0, 0, 0], sizes = [2, 8, 16], strides = [1, 1, 1]} : vector<2x8x64xf32> to vector<2x8x16xf32>
      %93 = arith.truncf %92 : vector<2x8x16xf32> to vector<2x8x16xbf16>
      %94 = vector.extract_strided_slice %89 {offsets = [0, 0, 0], sizes = [2, 8, 16], strides = [1, 1, 1]} : vector<2x8x64xf32> to vector<2x8x16xf32>
      %95 = arith.truncf %94 : vector<2x8x16xf32> to vector<2x8x16xbf16>
      %96 = vector.extract_strided_slice %91 {offsets = [0, 0, 0], sizes = [2, 8, 16], strides = [1, 1, 1]} : vector<2x8x64xf32> to vector<2x8x16xf32>
      %97 = arith.truncf %96 : vector<2x8x16xf32> to vector<2x8x16xbf16>
      "tpu.trace_start"() <{level = 10 : i32, message = "bqd,bkd->bqk"}> : () -> ()
      %cst_55 = arith.constant dense<0.000000e+00> : vector<2x8x8xf32>
      %98 = tpu.matmul %93, %95, %cst_55 {dimension_numbers = #tpu.dot_dimension_numbers<[2], [2], [1], [1], [0, 0, 0, 1, 1, 1], [0], [0]>} : vector<2x8x16xbf16>, vector<2x8x16xbf16>, vector<2x8x8xf32> -> vector<2x8x8xf32>
      "tpu.trace_stop"() : () -> ()
      %99 = vector.broadcast %29 : vector<2x1x8xf32> to vector<2x8x8xf32>
      %100 = arith.addf %98, %99 : vector<2x8x8xf32>
      %cst_56 = arith.constant dense<0xFF800000> : vector<2x8xf32>
      %101 = vector.multi_reduction <maximumf>, %100, %cst_56 [2] : vector<2x8x8xf32> to vector<2x8xf32>
      %102 = vector.shape_cast %101 : vector<2x8xf32> to vector<2x8x1xf32>
      %103 = vector.broadcast %102 : vector<2x8x1xf32> to vector<2x8x8xf32>
      %104 = arith.subf %100, %103 : vector<2x8x8xf32>
      %105 = math.exp %104 : vector<2x8x8xf32>
      %cst_57 = arith.constant dense<0.000000e+00> : vector<2x8xf32>
      %106 = vector.multi_reduction <add>, %105, %cst_57 [2] : vector<2x8x8xf32> to vector<2x8xf32>
      %107 = vector.shape_cast %106 : vector<2x8xf32> to vector<2x8x1xf32>
      %108 = tpu.reciprocal %107 {approx = true} : vector<2x8x1xf32> -> vector<2x8x1xf32>
      %109 = vector.broadcast %108 : vector<2x8x1xf32> to vector<2x8x8xf32>
      %110 = arith.mulf %105, %109 : vector<2x8x8xf32>
      %111 = arith.truncf %110 : vector<2x8x8xf32> to vector<2x8x8xbf16>
      "tpu.trace_start"() <{level = 10 : i32, message = "bqk,bkd->bqd"}> : () -> ()
      %cst_58 = arith.constant dense<0.000000e+00> : vector<2x8x16xf32>
      %112 = tpu.matmul %111, %97, %cst_58 {dimension_numbers = #tpu.dot_dimension_numbers<[2], [1], [1], [2], [0, 0, 0, 1, 1, 2], [0], [0]>} : vector<2x8x8xbf16>, vector<2x8x16xbf16>, vector<2x8x16xf32> -> vector<2x8x16xf32>
      "tpu.trace_stop"() : () -> ()
      %113 = vector.extract_strided_slice %87 {offsets = [0, 0, 16], sizes = [2, 8, 16], strides = [1, 1, 1]} : vector<2x8x64xf32> to vector<2x8x16xf32>
      %114 = arith.truncf %113 : vector<2x8x16xf32> to vector<2x8x16xbf16>
      %115 = vector.extract_strided_slice %89 {offsets = [0, 0, 16], sizes = [2, 8, 16], strides = [1, 1, 1]} : vector<2x8x64xf32> to vector<2x8x16xf32>
      %116 = arith.truncf %115 : vector<2x8x16xf32> to vector<2x8x16xbf16>
      %117 = vector.extract_strided_slice %91 {offsets = [0, 0, 16], sizes = [2, 8, 16], strides = [1, 1, 1]} : vector<2x8x64xf32> to vector<2x8x16xf32>
      %118 = arith.truncf %117 : vector<2x8x16xf32> to vector<2x8x16xbf16>
      "tpu.trace_start"() <{level = 10 : i32, message = "bqd,bkd->bqk"}> : () -> ()
      %cst_59 = arith.constant dense<0.000000e+00> : vector<2x8x8xf32>
      %119 = tpu.matmul %114, %116, %cst_59 {dimension_numbers = #tpu.dot_dimension_numbers<[2], [2], [1], [1], [0, 0, 0, 1, 1, 1], [0], [0]>} : vector<2x8x16xbf16>, vector<2x8x16xbf16>, vector<2x8x8xf32> -> vector<2x8x8xf32>
      "tpu.trace_stop"() : () -> ()
      %120 = vector.broadcast %29 : vector<2x1x8xf32> to vector<2x8x8xf32>
      %121 = arith.addf %119, %120 : vector<2x8x8xf32>
      %cst_60 = arith.constant dense<0xFF800000> : vector<2x8xf32>
      %122 = vector.multi_reduction <maximumf>, %121, %cst_60 [2] : vector<2x8x8xf32> to vector<2x8xf32>
      %123 = vector.shape_cast %122 : vector<2x8xf32> to vector<2x8x1xf32>
      %124 = vector.broadcast %123 : vector<2x8x1xf32> to vector<2x8x8xf32>
      %125 = arith.subf %121, %124 : vector<2x8x8xf32>
      %126 = math.exp %125 : vector<2x8x8xf32>
      %cst_61 = arith.constant dense<0.000000e+00> : vector<2x8xf32>
      %127 = vector.multi_reduction <add>, %126, %cst_61 [2] : vector<2x8x8xf32> to vector<2x8xf32>
      %128 = vector.shape_cast %127 : vector<2x8xf32> to vector<2x8x1xf32>
      %129 = tpu.reciprocal %128 {approx = true} : vector<2x8x1xf32> -> vector<2x8x1xf32>
      %130 = vector.broadcast %129 : vector<2x8x1xf32> to vector<2x8x8xf32>
      %131 = arith.mulf %126, %130 : vector<2x8x8xf32>
      %132 = arith.truncf %131 : vector<2x8x8xf32> to vector<2x8x8xbf16>
      "tpu.trace_start"() <{level = 10 : i32, message = "bqk,bkd->bqd"}> : () -> ()
      %cst_62 = arith.constant dense<0.000000e+00> : vector<2x8x16xf32>
      %133 = tpu.matmul %132, %118, %cst_62 {dimension_numbers = #tpu.dot_dimension_numbers<[2], [1], [1], [2], [0, 0, 0, 1, 1, 2], [0], [0]>} : vector<2x8x8xbf16>, vector<2x8x16xbf16>, vector<2x8x16xf32> -> vector<2x8x16xf32>
      "tpu.trace_stop"() : () -> ()
      %134 = vector.extract_strided_slice %87 {offsets = [0, 0, 32], sizes = [2, 8, 16], strides = [1, 1, 1]} : vector<2x8x64xf32> to vector<2x8x16xf32>
      %135 = arith.truncf %134 : vector<2x8x16xf32> to vector<2x8x16xbf16>
      %136 = vector.extract_strided_slice %89 {offsets = [0, 0, 32], sizes = [2, 8, 16], strides = [1, 1, 1]} : vector<2x8x64xf32> to vector<2x8x16xf32>
      %137 = arith.truncf %136 : vector<2x8x16xf32> to vector<2x8x16xbf16>
      %138 = vector.extract_strided_slice %91 {offsets = [0, 0, 32], sizes = [2, 8, 16], strides = [1, 1, 1]} : vector<2x8x64xf32> to vector<2x8x16xf32>
      %139 = arith.truncf %138 : vector<2x8x16xf32> to vector<2x8x16xbf16>
      "tpu.trace_start"() <{level = 10 : i32, message = "bqd,bkd->bqk"}> : () -> ()
      %cst_63 = arith.constant dense<0.000000e+00> : vector<2x8x8xf32>
      %140 = tpu.matmul %135, %137, %cst_63 {dimension_numbers = #tpu.dot_dimension_numbers<[2], [2], [1], [1], [0, 0, 0, 1, 1, 1], [0], [0]>} : vector<2x8x16xbf16>, vector<2x8x16xbf16>, vector<2x8x8xf32> -> vector<2x8x8xf32>
      "tpu.trace_stop"() : () -> ()
      %141 = vector.broadcast %29 : vector<2x1x8xf32> to vector<2x8x8xf32>
      %142 = arith.addf %140, %141 : vector<2x8x8xf32>
      %cst_64 = arith.constant dense<0xFF800000> : vector<2x8xf32>
      %143 = vector.multi_reduction <maximumf>, %142, %cst_64 [2] : vector<2x8x8xf32> to vector<2x8xf32>
      %144 = vector.shape_cast %143 : vector<2x8xf32> to vector<2x8x1xf32>
      %145 = vector.broadcast %144 : vector<2x8x1xf32> to vector<2x8x8xf32>
      %146 = arith.subf %142, %145 : vector<2x8x8xf32>
      %147 = math.exp %146 : vector<2x8x8xf32>
      %cst_65 = arith.constant dense<0.000000e+00> : vector<2x8xf32>
      %148 = vector.multi_reduction <add>, %147, %cst_65 [2] : vector<2x8x8xf32> to vector<2x8xf32>
      %149 = vector.shape_cast %148 : vector<2x8xf32> to vector<2x8x1xf32>
      %150 = tpu.reciprocal %149 {approx = true} : vector<2x8x1xf32> -> vector<2x8x1xf32>
      %151 = vector.broadcast %150 : vector<2x8x1xf32> to vector<2x8x8xf32>
      %152 = arith.mulf %147, %151 : vector<2x8x8xf32>
      %153 = arith.truncf %152 : vector<2x8x8xf32> to vector<2x8x8xbf16>
      "tpu.trace_start"() <{level = 10 : i32, message = "bqk,bkd->bqd"}> : () -> ()
      %cst_66 = arith.constant dense<0.000000e+00> : vector<2x8x16xf32>
      %154 = tpu.matmul %153, %139, %cst_66 {dimension_numbers = #tpu.dot_dimension_numbers<[2], [1], [1], [2], [0, 0, 0, 1, 1, 2], [0], [0]>} : vector<2x8x8xbf16>, vector<2x8x16xbf16>, vector<2x8x16xf32> -> vector<2x8x16xf32>
      "tpu.trace_stop"() : () -> ()
      %155 = vector.extract_strided_slice %87 {offsets = [0, 0, 48], sizes = [2, 8, 16], strides = [1, 1, 1]} : vector<2x8x64xf32> to vector<2x8x16xf32>
      %156 = arith.truncf %155 : vector<2x8x16xf32> to vector<2x8x16xbf16>
      %157 = vector.extract_strided_slice %89 {offsets = [0, 0, 48], sizes = [2, 8, 16], strides = [1, 1, 1]} : vector<2x8x64xf32> to vector<2x8x16xf32>
      %158 = arith.truncf %157 : vector<2x8x16xf32> to vector<2x8x16xbf16>
      %159 = vector.extract_strided_slice %91 {offsets = [0, 0, 48], sizes = [2, 8, 16], strides = [1, 1, 1]} : vector<2x8x64xf32> to vector<2x8x16xf32>
      %160 = arith.truncf %159 : vector<2x8x16xf32> to vector<2x8x16xbf16>
      "tpu.trace_start"() <{level = 10 : i32, message = "bqd,bkd->bqk"}> : () -> ()
      %cst_67 = arith.constant dense<0.000000e+00> : vector<2x8x8xf32>
      %161 = tpu.matmul %156, %158, %cst_67 {dimension_numbers = #tpu.dot_dimension_numbers<[2], [2], [1], [1], [0, 0, 0, 1, 1, 1], [0], [0]>} : vector<2x8x16xbf16>, vector<2x8x16xbf16>, vector<2x8x8xf32> -> vector<2x8x8xf32>
      "tpu.trace_stop"() : () -> ()
      %162 = vector.broadcast %29 : vector<2x1x8xf32> to vector<2x8x8xf32>
      %163 = arith.addf %161, %162 : vector<2x8x8xf32>
      %cst_68 = arith.constant dense<0xFF800000> : vector<2x8xf32>
      %164 = vector.multi_reduction <maximumf>, %163, %cst_68 [2] : vector<2x8x8xf32> to vector<2x8xf32>
      %165 = vector.shape_cast %164 : vector<2x8xf32> to vector<2x8x1xf32>
      %166 = vector.broadcast %165 : vector<2x8x1xf32> to vector<2x8x8xf32>
      %167 = arith.subf %163, %166 : vector<2x8x8xf32>
      %168 = math.exp %167 : vector<2x8x8xf32>
      %cst_69 = arith.constant dense<0.000000e+00> : vector<2x8xf32>
      %169 = vector.multi_reduction <add>, %168, %cst_69 [2] : vector<2x8x8xf32> to vector<2x8xf32>
      %170 = vector.shape_cast %169 : vector<2x8xf32> to vector<2x8x1xf32>
      %171 = tpu.reciprocal %170 {approx = true} : vector<2x8x1xf32> -> vector<2x8x1xf32>
      %172 = vector.broadcast %171 : vector<2x8x1xf32> to vector<2x8x8xf32>
      %173 = arith.mulf %168, %172 : vector<2x8x8xf32>
      %174 = arith.truncf %173 : vector<2x8x8xf32> to vector<2x8x8xbf16>
      "tpu.trace_start"() <{level = 10 : i32, message = "bqk,bkd->bqd"}> : () -> ()
      %cst_70 = arith.constant dense<0.000000e+00> : vector<2x8x16xf32>
      %175 = tpu.matmul %174, %160, %cst_70 {dimension_numbers = #tpu.dot_dimension_numbers<[2], [1], [1], [2], [0, 0, 0, 1, 1, 2], [0], [0]>} : vector<2x8x8xbf16>, vector<2x8x16xbf16>, vector<2x8x16xf32> -> vector<2x8x16xf32>
      "tpu.trace_stop"() : () -> ()
      %176 = tpu.concatenate %112, %133, %154, %175 in 2 : vector<2x8x16xf32>, vector<2x8x16xf32>, vector<2x8x16xf32>, vector<2x8x16xf32> -> vector<2x8x64xf32>
      %177 = vector.shape_cast %176 : vector<2x8x64xf32> to vector<16x64xf32>
      %178 = arith.truncf %177 : vector<16x64xf32> to vector<16x64xbf16>
      %cst_71 = arith.constant dense<0.000000e+00> : vector<16x64xf32>
      %179 = tpu.matmul %178, %4, %cst_71 {dimension_numbers = #tpu.dot_dimension_numbers<[1], [0], [0], [1], [0, 0, 1, 1], [], []>} : vector<16x64xbf16>, vector<64x64xbf16>, vector<16x64xf32> -> vector<16x64xf32>
      %180 = arith.addf %179, %7 : vector<16x64xf32>
      %181 = arith.addf %180, %arg25 : vector<16x64xf32>
      %cst_72 = arith.constant dense<0.000000e+00> : vector<16xf32>
      %182 = vector.multi_reduction <add>, %181, %cst_72 [1] : vector<16x64xf32> to vector<16xf32>
      %183 = vector.shape_cast %182 : vector<16xf32> to vector<16x1xf32>
      %cst_73 = arith.constant 6.400000e+01 : f32
      %184 = vector.broadcast %cst_73 : f32 to vector<16x1xf32>
      %185 = arith.divf %183, %184 : vector<16x1xf32>
      %186 = vector.broadcast %185 : vector<16x1xf32> to vector<16x64xf32>
      %187 = arith.subf %181, %186 : vector<16x64xf32>
      %188 = arith.mulf %187, %187 : vector<16x64xf32>
      %cst_74 = arith.constant dense<0.000000e+00> : vector<16xf32>
      %189 = vector.multi_reduction <add>, %188, %cst_74 [1] : vector<16x64xf32> to vector<16xf32>
      %190 = vector.shape_cast %189 : vector<16xf32> to vector<16x1xf32>
      %cst_75 = arith.constant 6.400000e+01 : f32
      %191 = vector.broadcast %cst_75 : f32 to vector<16x1xf32>
      %192 = arith.divf %190, %191 : vector<16x1xf32>
      %193 = vector.broadcast %185 : vector<16x1xf32> to vector<16x64xf32>
      %194 = arith.subf %181, %193 : vector<16x64xf32>
      %cst_76 = arith.constant 9.99999996E-13 : f32
      %195 = vector.broadcast %cst_76 : f32 to vector<16x1xf32>
      %196 = arith.addf %192, %195 : vector<16x1xf32>
      %197 = math.rsqrt %196 : vector<16x1xf32>
      %198 = vector.broadcast %197 : vector<16x1xf32> to vector<16x64xf32>
      %199 = arith.mulf %194, %198 : vector<16x64xf32>
      %200 = arith.mulf %199, %10 : vector<16x64xf32>
      %201 = arith.addf %200, %13 : vector<16x64xf32>
      %202 = arith.truncf %201 : vector<16x64xf32> to vector<16x64xbf16>
      %cst_77 = arith.constant dense<0.000000e+00> : vector<16x128xf32>
      %203 = tpu.matmul %202, %14, %cst_77 {dimension_numbers = #tpu.dot_dimension_numbers<[1], [0], [0], [1], [0, 0, 1, 1], [], []>} : vector<16x64xbf16>, vector<64x128xbf16>, vector<16x128xf32> -> vector<16x128xf32>
      %204 = arith.addf %203, %17 : vector<16x128xf32>
      %cst_78 = arith.constant 5.000000e-01 : f32
      %205 = vector.broadcast %cst_78 : f32 to vector<16x128xf32>
      %206 = arith.mulf %205, %204 : vector<16x128xf32>
      %cst_79 = arith.constant 4.471500e-02 : f32
      %207 = vector.broadcast %cst_79 : f32 to vector<16x128xf32>
      %208 = arith.mulf %207, %204 : vector<16x128xf32>
      %209 = arith.mulf %208, %204 : vector<16x128xf32>
      %210 = arith.mulf %209, %204 : vector<16x128xf32>
      %211 = arith.addf %204, %210 : vector<16x128xf32>
      %cst_80 = arith.constant 0.797884583 : f32
      %212 = vector.broadcast %cst_80 : f32 to vector<16x128xf32>
      %213 = arith.mulf %212, %211 : vector<16x128xf32>
      %214 = math.tanh %213 : vector<16x128xf32>
      %cst_81 = arith.constant 1.000000e+00 : f32
      %215 = vector.broadcast %cst_81 : f32 to vector<16x128xf32>
      %216 = arith.addf %215, %214 : vector<16x128xf32>
      %217 = arith.mulf %206, %216 : vector<16x128xf32>
      %218 = arith.truncf %217 : vector<16x128xf32> to vector<16x128xbf16>
      %cst_82 = arith.constant dense<0.000000e+00> : vector<16x64xf32>
      %219 = tpu.matmul %218, %18, %cst_82 {dimension_numbers = #tpu.dot_dimension_numbers<[1], [0], [0], [1], [0, 0, 1, 1], [], []>} : vector<16x128xbf16>, vector<128x64xbf16>, vector<16x64xf32> -> vector<16x64xf32>
      %220 = arith.addf %219, %21 : vector<16x64xf32>
      %221 = arith.addf %220, %201 : vector<16x64xf32>
      %cst_83 = arith.constant dense<0.000000e+00> : vector<16xf32>
      %222 = vector.multi_reduction <add>, %221, %cst_83 [1] : vector<16x64xf32> to vector<16xf32>
      %223 = vector.shape_cast %222 : vector<16xf32> to vector<16x1xf32>
      %cst_84 = arith.constant 6.400000e+01 : f32
      %224 = vector.broadcast %cst_84 : f32 to vector<16x1xf32>
      %225 = arith.divf %223, %224 : vector<16x1xf32>
      %226 = vector.broadcast %225 : vector<16x1xf32> to vector<16x64xf32>
      %227 = arith.subf %221, %226 : vector<16x64xf32>
      %228 = arith.mulf %227, %227 : vector<16x64xf32>
      %cst_85 = arith.constant dense<0.000000e+00> : vector<16xf32>
      %229 = vector.multi_reduction <add>, %228, %cst_85 [1] : vector<16x64xf32> to vector<16xf32>
      %230 = vector.shape_cast %229 : vector<16xf32> to vector<16x1xf32>
      %cst_86 = arith.constant 6.400000e+01 : f32
      %231 = vector.broadcast %cst_86 : f32 to vector<16x1xf32>
      %232 = arith.divf %230, %231 : vector<16x1xf32>
      %233 = vector.broadcast %225 : vector<16x1xf32> to vector<16x64xf32>
      %234 = arith.subf %221, %233 : vector<16x64xf32>
      %cst_87 = arith.constant 9.99999996E-13 : f32
      %235 = vector.broadcast %cst_87 : f32 to vector<16x1xf32>
      %236 = arith.addf %232, %235 : vector<16x1xf32>
      %237 = math.rsqrt %236 : vector<16x1xf32>
      %238 = vector.broadcast %237 : vector<16x1xf32> to vector<16x64xf32>
      %239 = arith.mulf %234, %238 : vector<16x64xf32>
      %240 = arith.mulf %239, %24 : vector<16x64xf32>
      %241 = arith.addf %240, %27 : vector<16x64xf32>
      scf.yield %241 : vector<16x64xf32>
    }
    %63 = vector.shape_cast %62 : vector<16x64xf32> to vector<2x8x64xf32>
    %64 = vector.extract_strided_slice %63 {offsets = [0, 0, 0], sizes = [2, 1, 64], strides = [1, 1, 1]} : vector<2x8x64xf32> to vector<2x1x64xf32>
    %65 = vector.shape_cast %64 : vector<2x1x64xf32> to vector<2x64xf32>
    %66 = arith.truncf %65 : vector<2x64xf32> to vector<2x64xbf16>
    %c0_40 = arith.constant 0 : index
    %c0_41 = arith.constant 0 : index
    %67 = vector.load %arg19[%c0_40, %c0_41] : memref<64x64xbf16, #tpu.memory_space<vmem>>, vector<64x64xbf16>
    %cst_42 = arith.constant dense<0.000000e+00> : vector<2x64xf32>
    %68 = tpu.matmul %66, %67, %cst_42 {dimension_numbers = #tpu.dot_dimension_numbers<[1], [0], [0], [1], [0, 0, 1, 1], [], []>} : vector<2x64xbf16>, vector<64x64xbf16>, vector<2x64xf32> -> vector<2x64xf32>
    %c0_43 = arith.constant 0 : index
    %c0_44 = arith.constant 0 : index
    %69 = vector.load %arg20[%c0_43, %c0_44] : memref<1x64xf32, #tpu.memory_space<vmem>>, vector<1x64xf32>
    %70 = vector.broadcast %69 : vector<1x64xf32> to vector<2x64xf32>
    %71 = arith.addf %68, %70 : vector<2x64xf32>
    %cst_45 = arith.constant 0.000000e+00 : f32
    %72 = vector.broadcast %cst_45 : f32 to vector<2x64xf32>
    %73 = arith.maximumf %71, %72 : vector<2x64xf32>
    %74 = arith.truncf %73 : vector<2x64xf32> to vector<2x64xbf16>
    %c0_46 = arith.constant 0 : index
    %c0_47 = arith.constant 0 : index
    %75 = vector.load %arg21[%c0_46, %c0_47] : memref<64x2xbf16, #tpu.memory_space<vmem>>, vector<64x2xbf16>
    %cst_48 = arith.constant dense<0.000000e+00> : vector<2x2xf32>
    %76 = tpu.matmul %74, %75, %cst_48 {dimension_numbers = #tpu.dot_dimension_numbers<[1], [0], [0], [1], [0, 0, 1, 1], [], []>} : vector<2x64xbf16>, vector<64x2xbf16>, vector<2x2xf32> -> vector<2x2xf32>
    %c0_49 = arith.constant 0 : index
    %c0_50 = arith.constant 0 : index
    %77 = vector.load %arg22[%c0_49, %c0_50] : memref<1x2xf32, #tpu.memory_space<vmem>>, vector<1x2xf32>
    %78 = vector.broadcast %77 : vector<1x2xf32> to vector<2x2xf32>
    %79 = arith.addf %76, %78 : vector<2x2xf32>
    %c0_51 = arith.constant 0 : index
    %c0_52 = arith.constant 0 : index
    %80 = vector.load %arg23[%c0_51, %c0_52] : memref<2x2xf32, #tpu.memory_space<vmem>>, vector<2x2xf32>
    tpu.vector_store %arg23[%c0_51, %c0_52], %79 {strides = array<i32>} : memref<2x2xf32, #tpu.memory_space<vmem>>, vector<2x2xf32>,
    return
  }
  func.func @transform_0(%arg0: i32) -> (i32, i32) {
    %c0_i32 = arith.constant 0 : i32
    %c0_i32_0 = arith.constant 0 : i32
    %c0_i32_1 = arith.constant 0 : i32
    return %c0_i32, %c0_i32_0 : i32, i32
  }
  func.func @transform_1(%arg0: i32) -> (i32, i32) {
    %c0_i32 = arith.constant 0 : i32
    %c0_i32_0 = arith.constant 0 : i32
    %c0_i32_1 = arith.constant 0 : i32
    return %c0_i32, %c0_i32_0 : i32, i32
  }
  func.func @transform_2(%arg0: i32) -> (i32, i32) {
    %c0_i32 = arith.constant 0 : i32
    %c0_i32_0 = arith.constant 0 : i32
    %c0_i32_1 = arith.constant 0 : i32
    return %c0_i32, %c0_i32_0 : i32, i32
  }
  func.func @transform_3(%arg0: i32) -> (i32, i32) {
    %c0_i32 = arith.constant 0 : i32
    %c0_i32_0 = arith.constant 0 : i32
    %c0_i32_1 = arith.constant 0 : i32
    return %c0_i32, %c0_i32_0 : i32, i32
  }
  func.func @transform_4(%arg0: i32) -> (i32, i32) {
    %c0_i32 = arith.constant 0 : i32
    %c0_i32_0 = arith.constant 0 : i32
    %c0_i32_1 = arith.constant 0 : i32
    return %c0_i32, %c0_i32_0 : i32, i32
  }
  func.func @transform_5(%arg0: i32) -> (i32, i32) {
    %c0_i32 = arith.constant 0 : i32
    %c0_i32_0 = arith.constant 0 : i32
    %c0_i32_1 = arith.constant 0 : i32
    return %c0_i32, %c0_i32_0 : i32, i32
  }
  func.func @transform_6(%arg0: i32) -> (i32, i32) {
    %c0_i32 = arith.constant 0 : i32
    %c0_i32_0 = arith.constant 0 : i32
    %c0_i32_1 = arith.constant 0 : i32
    return %c0_i32, %c0_i32_0 : i32, i32
  }
  func.func @transform_7(%arg0: i32) -> (i32, i32) {
    %c0_i32 = arith.constant 0 : i32
    %c0_i32_0 = arith.constant 0 : i32
    %c0_i32_1 = arith.constant 0 : i32
    return %c0_i32, %c0_i32_0 : i32, i32
  }
  func.func @transform_8(%arg0: i32) -> (i32, i32) {
    %c0_i32 = arith.constant 0 : i32
    %c0_i32_0 = arith.constant 0 : i32
    %c0_i32_1 = arith.constant 0 : i32
    return %c0_i32, %c0_i32_0 : i32, i32
  }
  func.func @transform_9(%arg0: i32) -> (i32, i32) {
    %c0_i32 = arith.constant 0 : i32
    %c0_i32_0 = arith.constant 0 : i32
    %c0_i32_1 = arith.constant 0 : i32
    return %c0_i32, %c0_i32_0 : i32, i32
  }
  func.func @transform_10(%arg0: i32) -> (i32, i32) {
    %c0_i32 = arith.constant 0 : i32
    %c0_i32_0 = arith.constant 0 : i32
    %c0_i32_1 = arith.constant 0 : i32
    return %c0_i32, %c0_i32_0 : i32, i32
  }
  func.func @transform_11(%arg0: i32) -> (i32, i32) {
    %c0_i32 = arith.constant 0 : i32
    %c0_i32_0 = arith.constant 0 : i32
    %c0_i32_1 = arith.constant 0 : i32
    return %c0_i32, %c0_i32_0 : i32, i32
  }
  func.func @transform_12(%arg0: i32) -> (i32, i32) {
    %c0_i32 = arith.constant 0 : i32
    %c0_i32_0 = arith.constant 0 : i32
    %c0_i32_1 = arith.constant 0 : i32
    return %c0_i32, %c0_i32_0 : i32, i32
  }
  func.func @transform_13(%arg0: i32) -> (i32, i32) {
    %c0_i32 = arith.constant 0 : i32
    %c0_i32_0 = arith.constant 0 : i32
    %c0_i32_1 = arith.constant 0 : i32
    return %c0_i32, %c0_i32_0 : i32, i32
  }
  func.func @transform_14(%arg0: i32) -> (i32, i32) {
    %c0_i32 = arith.constant 0 : i32
    %c0_i32_0 = arith.constant 0 : i32
    %c0_i32_1 = arith.constant 0 : i32
    return %c0_i32, %c0_i32_0 : i32, i32
  }
  func.func @transform_15(%arg0: i32) -> (i32, i32) {
    %c0_i32 = arith.constant 0 : i32
    %c0_i32_0 = arith.constant 0 : i32
    %c0_i32_1 = arith.constant 0 : i32
    return %c0_i32, %c0_i32_0 : i32, i32
  }
  func.func @transform_16(%arg0: i32) -> (i32, i32) {
    %c0_i32 = arith.constant 0 : i32
    %c0_i32_0 = arith.constant 0 : i32
    %c0_i32_1 = arith.constant 0 : i32
    return %c0_i32, %c0_i32_0 : i32, i32
  }
  func.func @transform_17(%arg0: i32) -> (i32, i32) {
    %c0_i32 = arith.constant 0 : i32
    %c0_i32_0 = arith.constant 0 : i32
    %c0_i32_1 = arith.constant 0 : i32
    return %c0_i32, %c0_i32_0 : i32, i32
  }
  func.func @transform_18(%arg0: i32) -> (i32, i32) {
    %c0_i32 = arith.constant 0 : i32
    %c0_i32_0 = arith.constant 0 : i32
    %c0_i32_1 = arith.constant 0 : i32
    return %c0_i32, %c0_i32_0 : i32, i32
  }
  func.func @transform_19(%arg0: i32) -> (i32, i32) {
    %c0_i32 = arith.constant 0 : i32
    %c0_i32_0 = arith.constant 0 : i32
    %c0_i32_1 = arith.constant 0 : i32
    return %c0_i32, %c0_i32_0 : i32, i32
  }
  func.func @transform_20(%arg0: i32) -> (i32, i32) {
    %c0_i32 = arith.constant 0 : i32
    %c0_i32_0 = arith.constant 0 : i32
    %c0_i32_1 = arith.constant 0 : i32
    return %c0_i32, %c0_i32_0 : i32, i32
  }
  func.func @transform_21(%arg0: i32) -> (i32, i32) {
    %c0_i32 = arith.constant 0 : i32
    %c0_i32_0 = arith.constant 0 : i32
    %c0_i32_1 = arith.constant 0 : i32
    return %c0_i32, %c0_i32_0 : i32, i32
  }
  func.func @transform_22(%arg0: i32) -> (i32, i32) {
    %c0_i32 = arith.constant 0 : i32
    %c0_i32_0 = arith.constant 0 : i32
    %c0_i32_1 = arith.constant 0 : i32
    return %c0_i32, %c0_i32_0 : i32, i32
  }
}

</mosaic_0001>

<bundles_post_ra>
// kernel: tpu_custom_call.1
= control target key start
LH: loop header
LB: loop body
LE: loop exit
PB: predicated region body
PF: predicated region fallthrough
CT: control target
= control target key end

     0   :  { %s2462_s0 = inlined_call_operand.hbm [shape: f32[16,32], index: 0, kind: input, shape index: {}]   ;;  %s2463_s1 = inlined_call_operand.vmem [shape: f32[2,8], index: 1, kind: input, shape index: {}]   ;;  %s2464_s2 = inlined_call_operand.vmem [shape: f32[1,32], index: 2, kind: input, shape index: {}]   ;;  %s2465_s3 = inlined_call_operand.vmem [shape: f32[1,32], index: 3, kind: input, shape index: {}]   ;;  %s2466_s4 = inlined_call_operand.hbm [shape: bf16[32,64], index: 4, kind: input, shape index: {}]   ;;  %s2467_s5 = inlined_call_operand.vmem [shape: f32[1,64], index: 5, kind: input, shape index: {}]   ;;  %s2468_s6 = inlined_call_operand.vmem [shape: bf16[64,192], index: 6, kind: input, shape index: {}]   ;;  %s2469_s7 = inlined_call_operand.vmem [shape: f32[1,192], index: 7, kind: input, shape index: {}]   ;;  %s2470_s8 = inlined_call_operand.vmem [shape: bf16[64,64], index: 8, kind: input, shape index: {}]   ;;  %s2471_s9 = inlined_call_operand.vmem [shape: f32[1,64], index: 9, kind: input, shape index: {}]   ;;  %s2472_s10 = inlined_call_operand.vmem [shape: f32[1,64], index: 10, kind: input, shape index: {}]   ;;  %s2473_s11 = inlined_call_operand.vmem [shape: f32[1,64], index: 11, kind: input, shape index: {}]   ;;  %s2474_s12 = inlined_call_operand.hbm [shape: bf16[64,128], index: 12, kind: input, shape index: {}]   ;;  %s2475_s13 = inlined_call_operand.vmem [shape: f32[1,128], index: 13, kind: input, shape index: {}]   ;;  %s2476_s14 = inlined_call_operand.vmem [shape: bf16[128,64], index: 14, kind: input, shape index: {}]   ;;  %s2477_s15 = inlined_call_operand.vmem [shape: f32[1,64], index: 15, kind: input, shape index: {}]   ;;  %s2478_s16 = inlined_call_operand.vmem [shape: f32[1,64], index: 16, kind: input, shape index: {}]   ;;  %s2479_s17 = inlined_call_operand.vmem [shape: f32[1,64], index: 17, kind: input, shape index: {}]   ;;  %s2480_s18 = inlined_call_operand.hbm [shape: bf16[64,64], index: 18, kind: input, shape index: {}]   ;;  %s2481_s19 = inlined_call_operand.vmem [shape: f32[1,64], index: 19, kind: input, shape index: {}]   ;;  %s2482_s20 = inlined_call_operand.vmem [shape: bf16[64,2], index: 20, kind: input, shape index: {}]   ;;  %s2483_s21 = inlined_call_operand.vmem [shape: f32[1,2], index: 21, kind: input, shape index: {}]   ;;  %s2484_s22 = inlined_call_operand.hbm [shape: f32[2,2], index: 22, kind: output, shape index: {}]  }
   0x1   :  { %2490 = sst [smem:[#allocation34_spill]] %s2462_s0 }
   0x2   :  { %2491 = sst [smem:[#allocation35_spill]] %s2463_s1 }
   0x3   :  { %2492 = sst [smem:[#allocation36_spill]] %s2464_s2 }
   0x4   :  { %2493 = sst [smem:[#allocation37_spill]] %s2465_s3 }
   0x5   :  { %2494 = sst [smem:[#allocation38_spill]] %s2466_s4 }
   0x6   :  { %2495 = sst [smem:[#allocation39_spill]] %s2467_s5 }
   0x7   :  { %2496 = sst [smem:[#allocation40_spill]] %s2468_s6 }
   0x8   :  { %2497 = sst [smem:[#allocation41_spill]] %s2483_s21 }
   0x9   :  { %2498 = sst [smem:[#allocation42_spill]] %s2484_s22 }
   0xa   :  { %27 = vsyncpa [#allocation3], 0 }
   0xb   :  { %28 = vsyncpa [#allocation6], 0 }
   0xc   :  { %29 = vsyncpa [#allocation9], 0  ;;  %s2499_s29 = sld [smem:[#allocation38_spill]] }
  0x12   :  { %s54_s30 = sshll.u32 %s2499_s29, 4  ;;  %s55_s30 = int_to_ptr.hbm [resolvable:$true] %s54_s30 }
  0x13   :  { %30 = vsyncpa [#allocation4], 0  ;;  %s1789_s4 = smov [#allocation5]   ;;  %s2500_s5 = sld [smem:[#allocation34_spill]] }
  0x14   :  { %s56_s0 = sshll.u32 %s1789_s4, 4  ;;  %s1790_s6 = smov 64   ;;  %s57_s0 = int_to_ptr.vmem [resolvable:$true] %s56_s0 }
  0x15   :  { %s1791_s25 = smov 4   ;;  %s1792_s26 = smov [#allocation2]  }
  0x16   :  { %62 = dma.hbm_to_vmem [thread:$0]  %s55_s30, 256, %s57_s0, [#allocation6], %s1790_s6, %s1790_s6, %s1791_s25  }
  0x17   :  { %s37_s2 = sshll.u32 %s1792_s26, 4  ;;  %s1793_s27 = smov 128   ;;  %s38_s2 = int_to_ptr.vmem [resolvable:$true] %s37_s2 }
  0x18   :  { %s1794_s22 = smov 8   ;;  %s81_s29 = sshll.u32 %s2474_s12, 4  ;;  %s82_s29 = int_to_ptr.hbm [resolvable:$true] %s81_s29 }
  0x19   :  { %s35_s24 = sshll.u32 %s2500_s5, 4  ;;  %s1795_s4 = smov [#allocation7]   ;;  %s36_s24 = int_to_ptr.hbm [resolvable:$true] %s35_s24 }
  0x1a   :  { %43 = dma.hbm_to_vmem [thread:$0]  %s36_s24, 256, %s38_s2, [#allocation3], %s1793_s27, %s1793_s27, %s1794_s22  }
  0x1b   :  { %s83_s21 = sshll.u32 %s1795_s4, 4  ;;  %s104_s5 = sshll.u32 %s2480_s18, 4  ;;  %s84_s21 = int_to_ptr.vmem [resolvable:$true] %s83_s21  ;;  %s105_s5 = int_to_ptr.hbm [resolvable:$true] %s104_s5 }
  0x1c   :  { %89 = dma.hbm_to_vmem [thread:$0]  %s82_s29, 512, %s84_s21, [#allocation6], %s1790_s6, %s1790_s6, %s1791_s25  }
  0x1d   :  { %s1796_s30 = smov [#allocation8]  }
  0x1e   :  { %s106_s0 = sshll.u32 %s1796_s30, 4  ;;  %s107_s0 = int_to_ptr.vmem [resolvable:$true] %s106_s0 }
  0x1f   :  { %112 = dma.hbm_to_vmem [thread:$0]  %s105_s5, 512, %s107_s0, [#allocation9], %s1790_s6, %s1790_s6, %s1791_s25  }
  0x20   :  { %1769 = dma.done.wait [#allocation3], 256  }
  0x21   :  { %1770 = vsyncadd [#allocation3], 4294967040 }
  0x22   :  { %1771 = dma.done.wait [#allocation6], 768  }
  0x23   :  { %1772 = vsyncadd [#allocation6], 4294966528 }
  0x24   :  { %1773 = dma.done.wait [#allocation9], 512  }
  0x25   :  { %1774 = vsyncadd [#allocation9], 4294966784  ;;  %s2501_s24 = sld [smem:[#allocation40_spill]]  ;;  %v2017_v16 = vld [vmem:[%s2469_s7] sm:$0x3]  ;;  %vm217_vm0 = vcmask 261120  }
  0x26   :  { %v2022_v17 = vld [vmem:[%s2470_s8] sm:$0xf]  ;;  %v2029_v20 = vld [vmem:[%s2470_s8] sm:$0xf0]  ;;  %v2034_v21 = vld [vmem:[%s2470_s8 + $0x8] sm:$0xf] }
  0x27   :  { %v2039_v22 = vld [vmem:[%s2470_s8 + $0x8] sm:$0xf0]  ;;  %v2044_v23 = vld [vmem:[%s2470_s8 + $0x10] sm:$0xf]  ;;  %v2049_v24 = vld [vmem:[%s2470_s8 + $0x10] sm:$0xf0] }
  0x28   :  { %v2054_v25 = vld [vmem:[%s2470_s8 + $0x18] sm:$0xf]  ;;  %v2059_v26 = vld [vmem:[%s2470_s8 + $0x18] sm:$0xf0]  ;;  %v2064_v27 = vld [vmem:[%s2471_s9] ss:$0 sm:$0xff] }
  0x29   :  { %v2069_v28 = vld [vmem:[%s2472_s10] ss:$0 sm:$0xff]  ;;  %v2078_v31 = vld [vmem:[#allocation7] sm:$0xf0]  ;;  %v2080_v32 = vld [vmem:[#allocation7 + $0x8] sm:$0xf] }
  0x2a   :  { %v2074_v29 = vld [vmem:[%s2473_s11] ss:$0 sm:$0xff]  ;;  %v2082_v33 = vld [vmem:[#allocation7 + $0x8] sm:$0xf0]  ;;  %v2084_v34 = vld [vmem:[#allocation7 + $0x10] sm:$0xf] }
  0x2b   :  { %v1937_v0 = vld [vmem:[%s2501_s24 + $0x4] sm:$0xf]  ;;  %v1942_v1 = vld [vmem:[%s2501_s24] sm:$0xf]  ;;  %v1947_v2 = vld [vmem:[%s2501_s24 + $0x8] sm:$0xf0] }
  0x2c   :  { %2502 = vst [vmem:[#allocation15_spill] sm:$0xff] %v1937_v0  ;;  %v1952_v3 = vld [vmem:[%s2501_s24 + $0x4] sm:$0xf0]  ;;  %v1957_v4 = vld [vmem:[%s2501_s24 + $0x14] sm:$0xf]  ;;  %s2521_s28 = sld [smem:[#allocation35_spill]] }
  0x2d   :  { %2503 = vst [vmem:[#allocation16_spill] sm:$0xff] %v1942_v1  ;;  %v1962_v5 = vld [vmem:[%s2501_s24 + $0x10] sm:$0xf]  ;;  %v1967_v6 = vld [vmem:[%s2501_s24 + $0x18] sm:$0xf0]  ;;  %v213_v59 = vld [vmem:[#allocation2] sm:$0xff] }
  0x2e   :  { %2504 = vst [vmem:[#allocation17_spill] sm:$0xff] %v1947_v2  ;;  %v1972_v7 = vld [vmem:[%s2501_s24 + $0x14] sm:$0xf0]  ;;  %v1977_v8 = vld [vmem:[%s2501_s24 + $0x24] sm:$0xf]  ;;  %v218_v61 = vsel %vm217_vm0, %v213_v59, 0.0 }
  0x2f   :  { %2505 = vst [vmem:[#allocation18_spill] sm:$0xff] %v1952_v3  ;;  %v1982_v9 = vld [vmem:[%s2501_s24 + $0x20] sm:$0xf]  ;;  %v1987_v10 = vld [vmem:[%s2501_s24 + $0x28] sm:$0xf0]  ;;  %219 = vadd.xlane.f32.xlu0 %v218_v61  ;;  %v1797_v19 = vmov 32.0  }
  0x30   :  { %2506 = vst [vmem:[#allocation19_spill] sm:$0xff] %v1957_v4  ;;  %v1992_v11 = vld [vmem:[%s2501_s24 + $0x24] sm:$0xf0]  ;;  %v1997_v12 = vld [vmem:[%s2501_s24 + $0x34] sm:$0xf]  ;;  %1568 = vrcp.f32 %v1797_v19  ;;  %s2523_s4 = sld [smem:[#allocation37_spill]] }
  0x31   :  { %2507 = vst [vmem:[#allocation20_spill] sm:$0xff] %v1962_v5  ;;  %v2002_v13 = vld [vmem:[%s2501_s24 + $0x30] sm:$0xf]  ;;  %v2007_v14 = vld [vmem:[%s2501_s24 + $0x38] sm:$0xf0]  ;;  %v214_v62 = vld [vmem:[#allocation2 + $0x8] sm:$0xff] }
  0x32   :  { %v2012_v15 = vld [vmem:[%s2501_s24 + $0x34] sm:$0xf0]  ;;  %v2076_v30 = vld [vmem:[#allocation7] sm:$0xf]  ;;  %v2086_v35 = vld [vmem:[#allocation7 + $0x10] sm:$0xf0] }
  0x33   :  { %v2088_v36 = vld [vmem:[#allocation7 + $0x18] sm:$0xf]  ;;  %v2090_v37 = vld [vmem:[#allocation7 + $0x18] sm:$0xf0]  ;;  %v2095_v38 = vld [vmem:[%s2475_s13] ss:$0 sm:$0xff] }
  0x34   :  { %2508 = vst [vmem:[#allocation21_spill] sm:$0xff] %v2095_v38  ;;  %v2100_v39 = vld [vmem:[%s2476_s14] sm:$0xf]  ;;  %v2105_v40 = vld [vmem:[%s2476_s14] sm:$0xf0]  ;;  %v221_v63 = vsel %vm217_vm0, %v214_v62, 0.0 }
  0x35   :  { %2509 = vst [vmem:[#allocation22_spill] sm:$0xff] %v2100_v39  ;;  %v2110_v41 = vld [vmem:[%s2476_s14 + $0x8] sm:$0xf]  ;;  %v2115_v42 = vld [vmem:[%s2476_s14 + $0x8] sm:$0xf0]  ;;  %s2524_s5 = sld [smem:[#allocation39_spill]] }
  0x36   :  { %2510 = vst [vmem:[#allocation23_spill] sm:$0xff] %v2105_v40  ;;  %v2120_v43 = vld [vmem:[%s2476_s14 + $0x10] sm:$0xf]  ;;  %v2125_v44 = vld [vmem:[%s2476_s14 + $0x10] sm:$0xf0]  ;;  %v1569_v18 = vpop.eup %1568  ;;  %s2216_s30 = smov 0  }
  0x37   :  { %2511 = vst [vmem:[#allocation24_spill] sm:$0xff] %v2110_v41  ;;  %v2130_v45 = vld [vmem:[%s2476_s14 + $0x18] sm:$0xf]  ;;  %v2135_v46 = vld [vmem:[%s2476_s14 + $0x18] sm:$0xf0]  ;;  %222 = vadd.xlane.f32.xlu0 %v221_v63  ;;  %vm229_vm1 = vweird.f32 %v1569_v18 }
  0x38   :  { %2512 = vst [vmem:[#allocation25_spill] sm:$0xff] %v2115_v42  ;;  %v2140_v47 = vld [vmem:[%s2476_s14 + $0x20] sm:$0xf]  ;;  %v2145_v48 = vld [vmem:[%s2476_s14 + $0x20] sm:$0xf0] }
  0x39   :  { %2513 = vst [vmem:[#allocation26_spill] sm:$0xff] %v2120_v43  ;;  %v2150_v49 = vld [vmem:[%s2476_s14 + $0x28] sm:$0xf]  ;;  %v2155_v50 = vld [vmem:[%s2476_s14 + $0x28] sm:$0xf0] }
  0x3a   :  { %2514 = vst [vmem:[#allocation27_spill] sm:$0xff] %v2125_v44  ;;  %v2160_v51 = vld [vmem:[%s2476_s14 + $0x30] sm:$0xf]  ;;  %v2165_v52 = vld [vmem:[%s2476_s14 + $0x30] sm:$0xf0] }
  0x3b   :  { %2515 = vst [vmem:[#allocation28_spill] sm:$0xff] %v2130_v45  ;;  %v2170_v53 = vld [vmem:[%s2476_s14 + $0x38] sm:$0xf]  ;;  %v2175_v54 = vld [vmem:[%s2476_s14 + $0x38] sm:$0xf0] }
  0x3c   :  { %2516 = vst [vmem:[#allocation29_spill] sm:$0xff] %v2135_v46  ;;  %v2180_v55 = vld [vmem:[%s2477_s15] ss:$0 sm:$0xff]  ;;  %v1507_v45 = vld [vmem:[#allocation5 + $0x8] sm:$0xff] }
  0x3d   :  { %2517 = vst [vmem:[#allocation30_spill] sm:$0xff] %v2145_v48  ;;  %v2185_v56 = vld [vmem:[%s2478_s16] ss:$0 sm:$0xff]  ;;  %309 = vmatpush.bf16.msra.mxu0 %v1507_v45  ;;  %s2522_s16 = sld [smem:[#allocation36_spill]] }
  0x3e   :  { %2518 = vst [vmem:[#allocation31_spill] sm:$0xff] %v2180_v55  ;;  %v2190_v57 = vld [vmem:[%s2479_s17] ss:$0 sm:$0xff] }
  0x3f   :  { %2519 = vst [vmem:[#allocation32_spill] sm:$0xff] %v2185_v56  ;;  %v2195_v58 = vld [vmem:[%s2521_s28] sm:$0x3]  ;;  %v225_v56 = vmul.f32 32.0, %v1569_v18 }
  0x40   :  { %2520 = vst [vmem:[#allocation33_spill] sm:$0xff] %v2190_v57 }
  0x41   :  { %v226_v57 = vsub.f32 1.0, %v225_v56 }
  0x43   :  { %v227_v55 = vmul.f32 %v1569_v18, %v226_v57 }
  0x45   :  { %v228_v38 = vadd.f32 %v1569_v18, %v227_v55  ;;  %v1506_v55 = vld [vmem:[#allocation5] sm:$0xff] }
  0x46   :  { %310 = vmatpush.bf16.msra.mxu0 %v1506_v55 }
  0x47   :  { %v230_v40 = vsel %vm229_vm1, %v1569_v18, %v228_v38 }
  0xa2   :  { %v220_v39 = vpop.xlane.xlu0 %219 }
  0xa3   :  { %v231_v42 = vmul.f32 %v230_v40, %v220_v39 }
  0xa5   :  { %v233_v41 = vsub.f32 %v213_v59, %v231_v42 }
  0xa7   :  { %v235_v60 = vmul.f32 %v233_v41, %v233_v41 }
  0xa9   :  { %v237_v44 = vsel %vm217_vm0, %v235_v60, 0.0 }
  0xaa   :  { %238 = vadd.xlane.f32.xlu1 %v237_v44  ;;  %v223_v61 = vpop.xlane.xlu0 %222 }
  0xab   :  { %v232_v43 = vmul.f32 %v230_v40, %v223_v61 }
  0xad   :  { %v234_v46 = vsub.f32 %v214_v62, %v232_v43 }
  0xaf   :  { %v236_v63 = vmul.f32 %v234_v46, %v234_v46 }
  0xb1   :  { %v240_v19 = vsel %vm217_vm0, %v236_v63, 0.0 }
  0xb2   :  { %241 = vadd.xlane.f32.xlu1 %v240_v19 }
 0x11d   :  { %v239_v56 = vpop.xlane.xlu1 %238 }
 0x11e   :  { %v243_v57 = vmul.f32 %v239_v56, %v230_v40 }
 0x120   :  { %v245_v18 = vadd.f32 1e-12, %v243_v57 }
 0x122   :  { %1570 = vrsqrt.f32 %v245_v18  ;;  %vm253_vm3 = vweird.f32 %v245_v18 }
 0x125   :  { %v242_v38 = vpop.xlane.xlu1 %241 }
 0x126   :  { %v244_v39 = vmul.f32 %v242_v38, %v230_v40  ;;  %v1565_v40 = vld [vmem:[%s2522_s16] ss:$0 sm:$0xff] }
 0x128   :  { %v1571_v42 = vpop.eup %1570  ;;  %v246_v59 = vadd.f32 1e-12, %v244_v39 }
 0x129   :  { %v248_v44 = vmul.f32 %v1571_v42, %v245_v18  ;;  %vm254_vm2 = vweird.f32 %v1571_v42  ;;  %v1566_v18 = vld [vmem:[%s2523_s4] ss:$0 sm:$0xff] }
 0x12a   :  { %1572 = vrsqrt.f32 %v246_v59  ;;  %vm255_vm4 = vmor %vm253_vm3, %vm254_vm2  ;;  %vm263_vm6 = vweird.f32 %v246_v59 }
 0x12b   :  { %v249_v60 = vmul.f32 %v1571_v42, %v248_v44 }
 0x12d   :  { %v250_v43 = vmul.f32 0.5, %v249_v60 }
 0x12f   :  { %v251_v62 = vsub.f32 1.5, %v250_v43 }
 0x130   :  { %v1573_v61 = vpop.eup %1572 }
 0x131   :  { %v252_v63 = vmul.f32 %v1571_v42, %v251_v62  ;;  %v258_v19 = vmul.f32 %v1573_v61, %v246_v59  ;;  %vm264_vm5 = vweird.f32 %v1573_v61 }
 0x132   :  { %vm265_vm7 = vmor %vm263_vm6, %vm264_vm5 }
 0x133   :  { %v259_v45 = vmul.f32 %v1573_v61, %v258_v19  ;;  %v256_v56 = vsel %vm255_vm4, %v1571_v42, %v252_v63 }
 0x134   :  { %v267_v48 = vmul.f32 %v256_v56, %v233_v41  ;;  %v1567_v41 = vld [vmem:[%s2524_s5] ss:$0 sm:$0xff] }
 0x135   :  { %v260_v57 = vmul.f32 0.5, %v259_v45 }
 0x136   :  { %v272_v60 = vmul.f32 %v1565_v40, %v267_v48 }
 0x137   :  { %v261_v55 = vsub.f32 1.5, %v260_v57 }
 0x138   :  { %v277_v42 = vadd.f32 %v1566_v18, %v272_v60 }
 0x139   :  { %v262_v38 = vmul.f32 %v1573_v61, %v261_v55 }
 0x13b   :  { %v266_v39 = vsel %vm265_vm7, %v1573_v61, %v262_v38 }
 0x13c   :  { %v268_v44 = vmul.f32 %v266_v39, %v234_v46 }
 0x13e   :  { %v273_v43 = vmul.f32 %v1565_v40, %v268_v44 }
 0x140   :  { %v278_v62 = vadd.f32 %v1566_v18, %v273_v43 }
 0x142   :  { %v279_v63 = vpack.c.bf16 %v278_v62, %v277_v42 }
 0x144   :  { %1331 = vmatmul.msk.bf16.vlgmr.msra.gmra.mxu0 %vm217_vm0, %v279_v63 }
 0x1c1   :  { %v312_v19 = vpop.f32.mrf.mxu0 }
 0x1c2   :  { %v313_v59 = vadd.f32 %v1567_v41, %v312_v19  }
 0x1c9   :  { %v314_v45 = vpop.f32.mrf.mxu0 }
 0x1ca   :  { %v315_v61 = vadd.f32 %v1567_v41, %v314_v45  }
 0x1cb LB: > { %v1359_v46 = vor.u32 %v2012_v15, %v2002_v13  ;;  %v1351_v48 = vor.u32 %v1992_v11, %v1982_v9  ;;  %v2525_v5 = vld [vmem:[#allocation20_spill] sm:$0xff]  ;;  %v2527_v3 = vld [vmem:[#allocation18_spill] sm:$0xff]  ;;  %v325_v55 = vpack.c.bf16 %v1779_v61, %v1783_v59  ;;  %vm366_vm8 = vcmask 523264   ;;  %s1798_s0 = smov 48   ;;  %s1799_s8 = smov 64   ;;  %v2530_v4 = vld [vmem:[#allocation19_spill] sm:$0xff]  ;;  %s1787_s30 = sphi %s2216_s30, %s322_s30   ;;  %v1783_v59 = vphi %v313_v59, %v2550_v59   ;;  %v1779_v61 = vphi %v315_v61, %v2549_v61  }
 0x1cc   : > { %v1343_v56 = vor.u32 %v1972_v7, %v2525_v5  ;;  %v2526_v1 = vld [vmem:[#allocation16_spill] sm:$0xff]  ;;  %v2528_v38 = vperm.slane %v2017_v16, 0  ;;  %s1800_s9 = smov 112   ;;  %s1801_s10 = smov 32   ;;  %v2531_v2 = vld [vmem:[#allocation17_spill] sm:$0xff]  ;;  %v2532_v0 = vld [vmem:[#allocation15_spill] sm:$0xff] }
 0x1cd   : > { %374 = vmatpush.bf16.msra.mxu0 %v1359_v46  ;;  %v1335_v57 = vor.u32 %v2527_v3, %v2526_v1  ;;  %s1802_s11 = smov 96   ;;  %s1803_s12 = smov 16   ;;  %vm415_vm9 = vcmask 130048   ;;  %vm487_vm10 = vcmask 1043456   ;;  %vm459_vm11 = vcmask 64512  }
 0x1ce   : > { %v2529_v41 = vmov %v2528_v38  ;;  %s1804_s22 = smov 80   ;;  %vm899_vm12 = vcmask 392192   ;;  %s322_s30 = sadd.s32 1, %s1787_s30  }
 0x1cf   : > { %p319_p0 = scmp.ge.s32.totalorder %s322_s30, 2  }
 0x1d0   :  { %v1513_v9 = vld [vmem:[%s2482_s20 + $0x8] sm:$0xff] (%p319_p0)  ;;  %v1635_v11 = vld [vmem:[%s2481_s19] ss:$0 sm:$0xff] (%p319_p0)  ;;  %s2551_s14 = sld [smem:[#allocation41_spill]] (%p319_p0)  ;;  %s1806_s15 = smov (%p319_p0), [#allocation10]  }
 0x1d1   : > { %375 = vmatpush.bf16.msra.mxu0 %v1351_v48  ;;  %s1298_s16 = sshll.u32 (%p319_p0), %s1806_s15, 4  ;;  %s2552_s29 = sld [smem:[#allocation42_spill]] (%p319_p0)  ;;  %s1299_s16 = int_to_ptr.vmem [resolvable:$true] %s1298_s16 }
 0x1d5   : > { %376 = vmatpush.bf16.msra.mxu0 %v1343_v56 }
 0x1d7   :  { %s1300_s4 = sshll.u32 (%p319_p0), %s2552_s29, 4  ;;  %s1301_s4 = int_to_ptr.hbm [resolvable:$true] %s1300_s4 }
 0x1d9   : > { %377 = vmatpush.bf16.msra.mxu0 %v1335_v57 }
 0x1dc   : > { %1364 = vmatmul.msk.bf16.vlgmr.msra.gmra.mxu0 %vm366_vm8, %v325_v55 }
 0x259   : > { %v379_v40 = vpop.f32.mrf.mxu0 }
 0x25a   : > { %v380_v39 = vadd.f32 %v379_v40, %v2528_v38 }
 0x25c   : > { %v398_v44 = vmul.f32 0.25, %v380_v39  ;;  %v402_v60 = vpack.c.bf16 %v380_v39, %v380_v39 }
 0x25e   : > { %v400_v18 = vpack.c.bf16 %v398_v44, %v398_v44  ;;  %v411_v43 = vunpack.c.l.b16 %v402_v60  ;;  %v1363_v44 = vor.u32 %v1997_v12, %v2007_v14  ;;  %v1355_v60 = vor.u32 %v1977_v8, %v1987_v10  ;;  %v1512_v10 = vld [vmem:[%s2482_s20] sm:$0xff] (%p319_p0) }
 0x260   : > { %v412_v42 = vpack.c.b16 %v411_v43, %v411_v43  ;;  %v524_v62 = vunpack.c.l.b16 %v400_v18  ;;  %388 = vmatpush.bf16.msra.mxu1 %v1363_v44  ;;  %v1347_v43 = vor.u32 %v2530_v4, %v1967_v6  ;;  %v1508_v6 = vld [vmem:[#allocation8] sm:$0xff] (%p319_p0) }
 0x261   : > { %v381_v63 = vpop.f32.mrf.mxu0 }
 0x262   : > { %v382_v19 = vadd.f32 %v381_v63, %v2529_v41  ;;  %528 = vrot.lane.b32.xlu1 %v412_v42, %s1798_s0  ;;  %413 = vrot.lane.b32.xlu0 %v412_v42, %s1799_s8  ;;  %v525_v45 = vpack.c.b16 %v524_v62, %v524_v62 }
 0x264   : > { %v399_v46 = vmul.f32 0.25, %v382_v19  ;;  %v403_v48 = vpack.c.bf16 %v382_v19, %v382_v19  ;;  %526 = vrot.lane.b32.xlu2 %v525_v45, %s1800_s9  ;;  %389 = vmatpush.bf16.msra.mxu1 %v1355_v60 }
 0x266   : > { %v401_v56 = vpack.c.bf16 %v399_v46, %v399_v46  ;;  %v436_v57 = vunpack.c.l.b16 %v403_v48 }
 0x268   : > { %v437_v40 = vpack.c.b16 %v436_v57, %v436_v57  ;;  %v550_v38 = vunpack.c.l.b16 %v401_v56  ;;  %390 = vmatpush.bf16.msra.mxu1 %v1347_v43 }
 0x26a   : > { %554 = vrot.lane.b32.xlu1 %v437_v40, %s1798_s0  ;;  %438 = vrot.lane.b32.xlu0 %v437_v40, %s1799_s8  ;;  %v551_v39 = vpack.c.b16 %v550_v38, %v550_v38 }
 0x26c   : > { %552 = vrot.lane.b32.xlu2 %v551_v39, %s1800_s9 }
 0x272   : > { %672 = vrot.lane.b32.xlu1 %v437_v40, %s1801_s10  ;;  %649 = vrot.lane.b32.xlu0 %v412_v42, %s1801_s10 }
 0x274   : > { %647 = vrot.lane.b32.xlu2 %v525_v45, %s1802_s11 }
 0x27a   : > { %761 = vrot.lane.b32.xlu1 %v412_v42, %s1803_s12  ;;  %670 = vrot.lane.b32.xlu0 %v551_v39, %s1802_s11  ;;  %v1339_v42 = vor.u32 %v2532_v0, %v2531_v2 }
 0x27c   : > { %784 = vrot.lane.b32.xlu2 %v437_v40, %s1803_s12  ;;  %391 = vmatpush.bf16.msra.mxu1 %v1339_v42 }
 0x27f   : > { %1365 = vmatmul.msk.bf16.vlgmr.msra.gmra.mxu1 %vm366_vm8, %v325_v55 }
 0x282   : > { %782 = vrot.lane.b32.xlu1 %v551_v39, %s1804_s22  ;;  %759 = vrot.lane.b32.xlu0 %v525_v45, %s1804_s22 }
 0x2be   : > { %v527_v62 = vpop.permute.xlu2 %526 }
 0x2c6   : > { %v553_v63 = vpop.permute.xlu2 %552 }
 0x2ce   : > { %v648_v48 = vpop.permute.xlu2 %647 }
 0x2d4   : > { %v529_v41 = vpop.permute.xlu1 %528  ;;  %v414_v19 = vpop.permute.xlu0 %413 }
 0x2d5   : > { %v420_v45 = vsel %vm415_vm9, %v414_v19, 0  ;;  %v534_v46 = vsel %vm415_vm9, %v529_v41, 0 }
 0x2d6   : > { %429 = vmatpush.bf16.xpose.msra.mxu3 %v420_v45  ;;  %543 = vmatpush.bf16.xpose.msrb.mxu0 %v534_v46  ;;  %v785_v39 = vpop.permute.xlu2 %784 }
 0x2d7   : > { %v790_v41 = vsel %vm415_vm9, %v785_v39, 0 }
 0x2dc   : > { %v555_v57 = vpop.permute.xlu1 %554  ;;  %v439_v40 = vpop.permute.xlu0 %438 }
 0x2dd   : > { %1366 = vmatmul.msk.bf16.vlgmr.msra.gmra.mxu3 %vm415_vm9, %v400_v18  ;;  %1370 = vmatmul.msk.bf16.vlgmr.msrb.gmra.mxu0 %vm415_vm9, %v527_v62  ;;  %v444_v55 = vsel %vm415_vm9, %v439_v40, 0  ;;  %v560_v38 = vsel %vm415_vm9, %v555_v57, 0  ;;  %v2533_v40 = vperm.slane %v2017_v16, 1 }
 0x2de   : > { %453 = vmatpush.bf16.xpose.msrb.mxu3 %v444_v55  ;;  %569 = vmatpush.bf16.xpose.msrb.mxu1 %v560_v38 }
 0x2e4   : > { %v673_v44 = vpop.permute.xlu1 %672  ;;  %v650_v60 = vpop.permute.xlu0 %649 }
 0x2e5   : > { %v678_v43 = vsel %vm415_vm9, %v673_v44, 0  ;;  %v655_v42 = vsel %vm415_vm9, %v650_v60, 0  ;;  %1371 = vmatmul.msk.bf16.vlgmr.msrb.gmra.mxu1 %vm415_vm9, %v553_v63  ;;  %v406_v60 = vperm.slane %v2195_v58, 0 }
 0x2e6   : > { %664 = vmatpush.bf16.xpose.msra.mxu0 %v655_v42  ;;  %687 = vmatpush.bf16.xpose.msra.mxu1 %v678_v43 }
 0x2ec   : > { %v762_v18 = vpop.permute.xlu1 %761  ;;  %v671_v19 = vpop.permute.xlu0 %670 }
 0x2ed   : > { %v767_v62 = vsel %vm415_vm9, %v762_v18, 0  ;;  %1367 = vmatmul.msk.bf16.vlgmr.msrb.gmra.mxu3 %vm415_vm9, %v401_v56  ;;  %1374 = vmatmul.msk.bf16.vlgmr.msra.gmra.mxu0 %vm415_vm9, %v648_v48  ;;  %v2534_v48 = vmov %v2533_v40 }
 0x2ee   : > { %799 = vmatpush.bf16.xpose.msrb.mxu1 %v790_v41  ;;  %776 = vmatpush.bf16.xpose.msrb.mxu0 %v767_v62 }
 0x2f4   : > { %v760_v45 = vpop.permute.xlu0 %759  ;;  %v783_v63 = vpop.permute.xlu1 %782 }
 0x2f5   : > { %1375 = vmatmul.msk.bf16.vlgmr.msra.gmra.mxu1 %vm415_vm9, %v671_v19 }
 0x2fc   : > { %v393_v46 = vpop.f32.mrf.mxu1 }
 0x2fd   : > { %1378 = vmatmul.msk.bf16.vlgmr.msrb.gmra.mxu0 %vm415_vm9, %v760_v45  ;;  %v394_v39 = vadd.f32 %v393_v46, %v2534_v48 }
 0x2ff   : > { %v404_v44 = vpack.c.bf16 %v394_v39, %v394_v39 }
 0x301   : > { %v489_v43 = vsel %vm487_vm10, %v404_v44, 0 }
 0x302   : > { %498 = vmatpush.bf16.msra.mxu2 %v489_v43 }
 0x304   : > { %v395_v57 = vpop.f32.mrf.mxu1 }
 0x305   : > { %1379 = vmatmul.msk.bf16.vlgmr.msrb.gmra.mxu1 %vm415_vm9, %v783_v63  ;;  %v396_v55 = vadd.f32 %v395_v57, %v2533_v40  ;;  %v2535_v57 = vrot.slane %v2195_v58, 1 }
 0x307   : > { %v2281_v38 = vpack.c.bf16 %v396_v55, %v396_v55  ;;  %v407_v40 = vperm.slane %v2535_v57, 0 }
 0x309   : > { %v508_v56 = vsel %vm487_vm10, %v2281_v38, 0 }
 0x30a   : > { %517 = vmatpush.bf16.msra.mxu3 %v508_v56 }
 0x35a   : > { %v545_v42 = vpop.f32.mrf.mxu0 }
 0x35b   : > { %v546_v41 = vadd.f32 %v545_v42, %v406_v60  ;;  %v600_v42 = vunpack.c.l.b16 %v404_v44 }
 0x35d   : > { %v575_v18 = vsel %vm459_vm11, %v546_v41, -inf  ;;  %v2294_v2 = vpack.c.b16 %v600_v42, %v600_v42 }
 0x35e   : > { %576 = vmax.xlane.f32.xlu1 %v575_v18 }
 0x360   : > { %v431_v62 = vpop.f32.mrf.mxu3 }
 0x361   : > { %v432_v19 = vadd.f32 %v431_v62, %v406_v60 }
 0x362   : > { %v547_v45 = vpop.f32.mrf.mxu0  ;;  %v571_v63 = vpop.f32.mrf.mxu1 }
 0x363   : > { %v460_v46 = vsel %vm459_vm11, %v432_v19, -inf  ;;  %v572_v55 = vadd.f32 %v571_v63, %v407_v40 }
 0x364   : > { %461 = vmax.xlane.f32.xlu2 %v460_v46 }
 0x365   : > { %v578_v43 = vsel %vm459_vm11, %v572_v55, -inf }
 0x368   : > { %v433_v56 = vpop.f32.mrf.mxu3 }
 0x36a   : > { %v573_v48 = vpop.f32.mrf.mxu1  ;;  %v666_v39 = vpop.f32.mrf.mxu0 }
 0x36b   : > { %v667_v0 = vadd.f32 %v666_v39, %v406_v60 }
 0x36c   : > { %579 = vmax.xlane.f32.xlu2 %v578_v43 }
 0x36d   : > { %v693_v3 = vsel %vm459_vm11, %v667_v0, -inf }
 0x370   : > { %v455_v18 = vpop.f32.mrf.mxu3 }
 0x371   : > { %v456_v1 = vadd.f32 %v455_v18, %v407_v40 }
 0x372   : > { %v668_v62 = vpop.f32.mrf.mxu0  ;;  %v689_v45 = vpop.f32.mrf.mxu1 }
 0x373   : > { %v463_v57 = vsel %vm459_vm11, %v456_v1, -inf  ;;  %v690_v63 = vadd.f32 %v689_v45, %v407_v40 }
 0x374   : > { %464 = vmax.xlane.f32.xlu0 %v463_v57  ;;  %694 = vmax.xlane.f32.xlu2 %v693_v3 }
 0x375   : > { %v696_v48 = vsel %vm459_vm11, %v690_v63, -inf }
 0x377   : > { %602 = vrot.lane.b32.xlu1 %v2294_v2, %s1800_s9 }
 0x378   : > { %v457_v46 = vpop.f32.mrf.mxu3 }
 0x37a   : > { %v691_v56 = vpop.f32.mrf.mxu1  ;;  %v778_v44 = vpop.f32.mrf.mxu0 }
 0x37b   : > { %v779_v3 = vadd.f32 %v778_v44, %v406_v60 }
 0x37c   : > { %697 = vmax.xlane.f32.xlu0 %v696_v48 }
 0x37d   : > { %v805_v45 = vsel %vm459_vm11, %v779_v3, -inf }
 0x382   : > { %v780_v39 = vpop.f32.mrf.mxu0  ;;  %v801_v43 = vpop.f32.mrf.mxu1 }
 0x383   : > { %v2301_v42 = vadd.f32 %v801_v43, %v407_v40 }
 0x385   : > { %v808_v18 = vsel %vm459_vm11, %v2301_v42, -inf }
 0x386   : > { %809 = vmax.xlane.f32.xlu2 %v808_v18 }
 0x38a   : > { %v803_v62 = vpop.f32.mrf.mxu1 }
 0x390   : > { %717 = vrot.lane.b32.xlu0 %v2294_v2, %s1802_s11 }
 0x3a1   : > { %806 = vmax.xlane.f32.xlu1 %v805_v45 }
 0x3d1   : > { %v577_v57 = vpop.xlane.xlu1 %576 }
 0x3d2   : > { %v581_v46 = vsub.f32 %v546_v41, %v577_v57 }
 0x3d4   : > { %v583_v56 = vmul.f32 1.442695, %v581_v46 }
 0x3d6   : > { %1589 = vpow2.f32 %v583_v56 }
 0x3d7   : > { %v462_v48 = vpop.xlane.xlu2 %461 }
 0x3d8   : > { %v466_v39 = vsub.f32 %v432_v19, %v462_v48 }
 0x3da   : > { %v468_v40 = vmul.f32 1.442695, %v466_v39 }
 0x3dc   : > { %v2308_v43 = vpop.eup %1589  ;;  %1591 = vpow2.f32 %v468_v40 }
 0x3dd   : > { %v587_v18 = vsel %vm459_vm11, %v2308_v43, 0.0 }
 0x3de   : > { %588 = vadd.xlane.f32.xlu2 %v587_v18  ;;  %v624_v18 = vunpack.c.l.b16 %v2281_v38 }
 0x3df   : > { %v580_v62 = vpop.xlane.xlu2 %579 }
 0x3e0   : > { %v582_v4 = vsub.f32 %v572_v55, %v580_v62 }
 0x3e2   : > { %v1592_v60 = vpop.eup %1591  ;;  %v585_v44 = vmul.f32 1.442695, %v582_v4 }
 0x3e3   : > { %v472_v45 = vsel %vm459_vm11, %v1592_v60, 0.0 }
 0x3e4   : > { %1593 = vpow2.f32 %v585_v44  ;;  %473 = vadd.xlane.f32.xlu0 %v472_v45 }
 0x3e7   : > { %v465_v41 = vpop.xlane.xlu0 %464  ;;  %v695_v57 = vpop.xlane.xlu2 %694 }
 0x3e8   : > { %v467_v46 = vsub.f32 %v456_v1, %v465_v41  ;;  %v699_v19 = vsub.f32 %v667_v0, %v695_v57  ;;  %v625_v41 = vpack.c.b16 %v624_v18, %v624_v18 }
 0x3e9   : > { %v603_v56 = vpop.permute.xlu1 %602 }
 0x3ea   : > { %v2313_v48 = vpop.eup %1593  ;;  %v470_v39 = vmul.f32 1.442695, %v467_v46  ;;  %v701_v40 = vmul.f32 1.442695, %v699_v19  ;;  %v608_v5 = vsel %vm487_vm10, %v603_v56, 0 }
 0x3eb   : > { %v590_v55 = vsel %vm459_vm11, %v2313_v48, 0.0  ;;  %617 = vmatpush.bf16.msrb.mxu2 %v608_v5 }
 0x3ec   : > { %1595 = vpow2.f32 %v470_v39  ;;  %591 = vadd.xlane.f32.xlu0 %v590_v55 }
 0x3ed   : > { %1597 = vpow2.f32 %v701_v40 }
 0x3ef   : > { %v698_v4 = vpop.xlane.xlu0 %697 }
 0x3f0   : > { %v700_v62 = vsub.f32 %v690_v63, %v698_v4 }
 0x3f2   : > { %v1596_v1 = vpop.eup %1595  ;;  %v703_v0 = vmul.f32 1.442695, %v700_v62 }
 0x3f3   : > { %v1598_v44 = vpop.eup %1597  ;;  %v475_v45 = vsel %vm459_vm11, %v1596_v1, 0.0 }
 0x3f4   : > { %1599 = vpow2.f32 %v703_v0  ;;  %476 = vadd.xlane.f32.xlu1 %v475_v45  ;;  %v705_v57 = vsel %vm459_vm11, %v1598_v44, 0.0 }
 0x3f5   : > { %706 = vadd.xlane.f32.xlu0 %v705_v57 }
 0x3f6   : > { %626 = vrot.lane.b32.xlu2 %v625_v41, %s1800_s9 }
 0x3f9   : > { %v810_v40 = vpop.xlane.xlu2 %809 }
 0x3fa   : > { %v2322_v5 = vpop.eup %1599  ;;  %v812_v55 = vsub.f32 %v2301_v42, %v810_v40 }
 0x3fb   : > { %v708_v46 = vsel %vm459_vm11, %v2322_v5, 0.0 }
 0x3fc   : > { %v815_v4 = vmul.f32 1.442695, %v812_v55 }
 0x3fd   : > { %709 = vadd.xlane.f32.xlu0 %v708_v46 }
 0x40d   : > { %738 = vrot.lane.b32.xlu1 %v625_v41, %s1802_s11 }
 0x411   : > { %829 = vrot.lane.b32.xlu0 %v2294_v2, %s1804_s22 }
 0x414   : > { %v807_v38 = vpop.xlane.xlu1 %806 }
 0x415   : > { %v811_v63 = vsub.f32 %v779_v3, %v807_v38  ;;  %v718_v3 = vpop.permute.xlu0 %717 }
 0x416   : > { %v723_v42 = vsel %vm487_vm10, %v718_v3, 0 }
 0x417   : > { %v813_v19 = vmul.f32 1.442695, %v811_v63 }
 0x419   : > { %1601 = vpow2.f32 %v813_v19  ;;  %850 = vrot.lane.b32.xlu0 %v625_v41, %s1804_s22 }
 0x41a   : > { %1603 = vpow2.f32 %v815_v4 }
 0x41f   : > { %v2330_v56 = vpop.eup %1601 }
 0x420   : > { %v817_v39 = vsel %vm459_vm11, %v2330_v56, 0.0  ;;  %v2335_v18 = vpop.eup %1603 }
 0x421   : > { %818 = vadd.xlane.f32.xlu2 %v817_v39  ;;  %v820_v2 = vsel %vm459_vm11, %v2335_v18, 0.0 }
 0x437   : > { %821 = vadd.xlane.f32.xlu1 %v820_v2 }
 0x451   : > { %v589_v62 = vpop.xlane.xlu2 %588 }
 0x457   : > { %v474_v0 = vpop.xlane.xlu0 %473 }
 0x458   : > { %1605 = vrcp.f32 %v474_v0 }
 0x459   : > { %v627_v45 = vpop.permute.xlu2 %626  ;;  %1607 = vrcp.f32 %v589_v62 }
 0x45a   : > { %v632_v41 = vsel %vm487_vm10, %v627_v45, 0 }
 0x45b   : > { %641 = vmatpush.bf16.msrb.mxu3 %v632_v41 }
 0x45e   : > { %v1606_v57 = vpop.eup %1605 }
 0x45f   : > { %v480_v46 = vmul.f32 %v1606_v57, %v1592_v60  ;;  %v592_v63 = vpop.xlane.xlu0 %591  ;;  %v1608_v39 = vpop.eup %1607 }
 0x460   : > { %v595_v40 = vmul.f32 %v1608_v39, %v2308_v43 }
 0x461   : > { %v482_v38 = vpack.c.bf16 %v480_v46, %v480_v46 }
 0x462   : > { %v597_v45 = vpack.c.bf16 %v595_v40, %v595_v40 }
 0x463   : > { %1368 = vmatmul.msk.bf16.vlgmr.msra.gmra.mxu2 %vm459_vm11, %v482_v38 }
 0x464   : > { %732 = vmatpush.bf16.msra.mxu2 %v723_v42 }
 0x467   : > { %v477_v19 = vpop.xlane.xlu1 %476 }
 0x468   : > { %1609 = vrcp.f32 %v477_v19  ;;  %v707_v0 = vpop.xlane.xlu0 %706 }
 0x469   : > { %1611 = vrcp.f32 %v592_v63 }
 0x46a   : > { %1613 = vrcp.f32 %v707_v0 }
 0x46e   : > { %v1610_v55 = vpop.eup %1609 }
 0x46f   : > { %v481_v4 = vmul.f32 %v1610_v55, %v1596_v1  ;;  %v1612_v60 = vpop.eup %1611 }
 0x470   : > { %v1614_v3 = vpop.eup %1613  ;;  %v710_v62 = vpop.xlane.xlu0 %709  ;;  %v596_v41 = vmul.f32 %v1612_v60, %v2313_v48 }
 0x471   : > { %v483_v2 = vpack.c.bf16 %v481_v4, %v481_v4  ;;  %v713_v57 = vmul.f32 %v1614_v3, %v1598_v44  ;;  %1615 = vrcp.f32 %v710_v62 }
 0x472   : > { %v598_v38 = vpack.c.bf16 %v596_v41, %v596_v41 }
 0x473   : > { %1369 = vmatmul.msk.bf16.vlgmr.msra.gmra.mxu3 %vm459_vm11, %v483_v2  ;;  %1372 = vmatmul.msk.bf16.vlgmr.msrb.gmra.mxu2 %vm459_vm11, %v597_v45  ;;  %v715_v1 = vpack.c.bf16 %v713_v57, %v713_v57 }
 0x477   : > { %v1616_v19 = vpop.eup %1615 }
 0x478   : > { %v714_v44 = vmul.f32 %v1616_v19, %v2322_v5 }
 0x47a   : > { %v716_v40 = vpack.c.bf16 %v714_v44, %v714_v44 }
 0x47f   : > { %v739_v46 = vpop.permute.xlu1 %738 }
 0x480   : > { %v744_v43 = vsel %vm487_vm10, %v739_v46, 0 }
 0x481   : > { %753 = vmatpush.bf16.msra.mxu3 %v744_v43 }
 0x483   : > { %v830_v42 = vpop.permute.xlu0 %829  ;;  %1373 = vmatmul.msk.bf16.vlgmr.msrb.gmra.mxu3 %vm459_vm11, %v598_v38  ;;  %1376 = vmatmul.msk.bf16.vlgmr.msra.gmra.mxu2 %vm459_vm11, %v715_v1 }
 0x484   : > { %v835_v63 = vsel %vm487_vm10, %v830_v42, 0 }
 0x485   : > { %844 = vmatpush.bf16.msrb.mxu2 %v835_v63 }
 0x48b   : > { %v851_v39 = vpop.permute.xlu0 %850 }
 0x48c   : > { %v856_v48 = vsel %vm487_vm10, %v851_v39, 0 }
 0x48d   : > { %865 = vmatpush.bf16.msrb.mxu3 %v856_v48 }
 0x493   : > { %1377 = vmatmul.msk.bf16.vlgmr.msra.gmra.mxu3 %vm459_vm11, %v716_v40 }
 0x494   : > { %v819_v55 = vpop.xlane.xlu2 %818 }
 0x495   : > { %1617 = vrcp.f32 %v819_v55 }
 0x49b   : > { %v1618_v4 = vpop.eup %1617 }
 0x49c   : > { %v825_v2 = vmul.f32 %v1618_v4, %v2330_v56 }
 0x49e   : > { %v827_v0 = vpack.c.bf16 %v825_v2, %v825_v2 }
 0x4a0   : > { %1380 = vmatmul.msk.bf16.vlgmr.msrb.gmra.mxu2 %vm459_vm11, %v827_v0  ;;  %v1397_v0 = vor.u32 %v2059_v26, %v2054_v25 }
 0x4a2   : > { %934 = vmatpush.bf16.msra.mxu0 %v1397_v0 }
 0x4aa   : > { %v822_v45 = vpop.xlane.xlu1 %821 }
 0x4ab   : > { %1619 = vrcp.f32 %v822_v45  ;;  %v1393_v45 = vor.u32 %v2049_v24, %v2044_v23 }
 0x4ad   : > { %935 = vmatpush.bf16.msra.mxu0 %v1393_v45 }
 0x4b1   : > { %v1620_v60 = vpop.eup %1619 }
 0x4b2   : > { %v826_v3 = vmul.f32 %v1620_v60, %v2335_v18  ;;  %v1389_v60 = vor.u32 %v2039_v22, %v2034_v21 }
 0x4b4   : > { %v828_v62 = vpack.c.bf16 %v826_v3, %v826_v3  ;;  %936 = vmatpush.bf16.msra.mxu0 %v1389_v60  ;;  %v1385_v3 = vor.u32 %v2029_v20, %v2022_v17  ;;  %v1636_v17 = vld [vmem:[%s2551_s14] ss:$0 sm:$0xff] (%p319_p0) }
 0x4b6   : > { %1381 = vmatmul.msk.bf16.vlgmr.msrb.gmra.mxu3 %vm459_vm11, %v828_v62 }
 0x4b8   : > { %937 = vmatpush.bf16.msra.mxu0 %v1385_v3 }
 0x4e6   : > { %v500_v5 = vpop.f32.mrf.mxu2 }
 0x4ee   : > { %v502_v41 = vpop.f32.mrf.mxu2 }
 0x4f6   : > { %v519_v57 = vpop.f32.mrf.mxu3  ;;  %v619_v46 = vpop.f32.mrf.mxu2 }
 0x4fe   : > { %v521_v43 = vpop.f32.mrf.mxu3  ;;  %v621_v38 = vpop.f32.mrf.mxu2 }
 0x506   : > { %v643_v1 = vpop.f32.mrf.mxu3  ;;  %v734_v42 = vpop.f32.mrf.mxu2 }
 0x507   : > { %v1574_v56 = vpack.i.bf16 %v643_v1, %v619_v46 }
 0x509   : > { %1575 = vrot.lane.b32.xlu0 %v1574_v56, %s1803_s12 }
 0x50e   : > { %v645_v63 = vpop.f32.mrf.mxu3  ;;  %v736_v19 = vpop.f32.mrf.mxu2 }
 0x516   : > { %v755_v39 = vpop.f32.mrf.mxu3 }
 0x517   : > { %v1579_v48 = vpack.i.bf16 %v755_v39, %v734_v42 }
 0x519   : > { %1580 = vrot.lane.b32.xlu0 %v1579_v48, %s1801_s10 }
 0x51e   : > { %v757_v18 = vpop.f32.mrf.mxu3 }
 0x523   : > { %v846_v44 = vpop.f32.mrf.mxu2 }
 0x52b   : > { %v848_v40 = vpop.f32.mrf.mxu2 }
 0x539   : > { %v867_v55 = vpop.f32.mrf.mxu3 }
 0x53a   : > { %v1584_v4 = vpack.i.bf16 %v867_v55, %v846_v44 }
 0x53c   : > { %1585 = vrot.lane.b32.xlu2 %v1584_v4, %s1798_s0 }
 0x541   : > { %v869_v2 = vpop.f32.mrf.mxu3 }
 0x57b   : > { %v1576_v62 = vpop.permute.xlu0 %1575 }
 0x57c   : > { %v1578_v46 = vunpack.i.h.bf16 %v1576_v62  ;;  %v1577_v43 = vunpack.i.l.bf16 %v1576_v62  ;;  %v1805_v62 = vmov 64.0  }
 0x57d   : > { %1621 = vrcp.f32 %v1805_v62 }
 0x57e   : > { %v895_v56 = vsel %vm415_vm9, %v500_v5, %v1577_v43  ;;  %v896_v63 = vsel %vm415_vm9, %v519_v57, %v1578_v46 }
 0x58b   : > { %v1581_v41 = vpop.permute.xlu0 %1580 }
 0x58c   : > { %v1583_v38 = vunpack.i.h.bf16 %v1581_v41  ;;  %v1582_v1 = vunpack.i.l.bf16 %v1581_v41  ;;  %v1622_v41 = vpop.eup %1621 }
 0x58d   : > { %v953_v46 = vmul.f32 64.0, %v1622_v41  ;;  %vm957_vm13 = vweird.f32 %v1622_v41 }
 0x58e   : > { %v898_v48 = vsel %vm217_vm0, %v896_v63, %v1583_v38  ;;  %v897_v18 = vsel %vm217_vm0, %v895_v56, %v1582_v1  ;;  %vm1291_vm0 = vcmask (%p319_p0), 9216  }
 0x58f   : > { %v954_v43 = vsub.f32 1.0, %v953_v46 }
 0x591   : > { %v955_v38 = vmul.f32 %v1622_v41, %v954_v43 }
 0x593   : > { %v956_v1 = vadd.f32 %v1622_v41, %v955_v38 }
 0x596   : > { %v1586_v42 = vpop.permute.xlu2 %1585 }
 0x597   : > { %v1588_v19 = vunpack.i.h.bf16 %v1586_v42  ;;  %v1587_v39 = vunpack.i.l.bf16 %v1586_v42 }
 0x599   : > { %v901_v44 = vsel %vm899_vm12, %v898_v48, %v1588_v19  ;;  %v900_v40 = vsel %vm899_vm12, %v897_v18, %v1587_v39  ;;  %vm1193_vm12 = vcmask (%p319_p0), 1041409  }
 0x59a   : > { %v902_v55 = vpack.c.bf16 %v901_v44, %v900_v40 }
 0x59c   : > { %1398 = vmatmul.msk.bf16.vlgmr.msra.gmra.mxu0 %vm366_vm8, %v902_v55  ;;  %v1414_v55 = vor.u32 %v2090_v37, %v2088_v36 }
 0x59e   : > { %1033 = vmatpush.bf16.msra.mxu1 %v1414_v55 }
 0x619   : > { %v939_v4 = vpop.f32.mrf.mxu0 }
 0x61a   : > { %v940_v2 = vadd.f32 %v2064_v27, %v939_v4  ;;  %v1410_v4 = vor.u32 %v2086_v35, %v2084_v34 }
 0x61c   : > { %v944_v0 = vadd.f32 %v1783_v59, %v940_v2  ;;  %v2379_v59 = vsel %vm957_vm13, %v1622_v41, %v956_v1  ;;  %1034 = vmatpush.bf16.msra.mxu1 %v1410_v4  ;;  %v1406_v2 = vor.u32 %v2082_v33, %v2080_v32 }
 0x61e   : > { %v946_v5 = vsel %vm366_vm8, %v944_v0, 0.0 }
 0x61f   : > { %947 = vadd.xlane.f32.xlu1 %v946_v5 }
 0x620   : > { %1035 = vmatpush.bf16.msra.mxu1 %v1406_v2 }
 0x621   : > { %v941_v57 = vpop.f32.mrf.mxu0 }
 0x622   : > { %v942_v45 = vadd.f32 %v2064_v27, %v941_v57 }
 0x624   : > { %v945_v60 = vadd.f32 %v1779_v61, %v942_v45  ;;  %v1402_v45 = vor.u32 %v2078_v31, %v2076_v30 }
 0x626   : > { %v949_v3 = vsel %vm366_vm8, %v945_v60, 0.0  ;;  %1036 = vmatpush.bf16.msra.mxu1 %v1402_v45 }
 0x627   : > { %950 = vadd.xlane.f32.xlu0 %v949_v3 }
 0x692   : > { %v948_v42 = vpop.xlane.xlu1 %947 }
 0x693   : > { %v959_v56 = vmul.f32 %v2379_v59, %v948_v42 }
 0x695   : > { %v961_v63 = vsub.f32 %v944_v0, %v959_v56 }
 0x697   : > { %v963_v19 = vmul.f32 %v961_v63, %v961_v63 }
 0x699   : > { %v965_v61 = vsel %vm366_vm8, %v963_v19, 0.0 }
 0x69a   : > { %v951_v39 = vpop.xlane.xlu0 %950  ;;  %966 = vadd.xlane.f32.xlu1 %v965_v61 }
 0x69b   : > { %v960_v48 = vmul.f32 %v2379_v59, %v951_v39 }
 0x69d   : > { %v962_v18 = vsub.f32 %v945_v60, %v960_v48 }
 0x69f   : > { %v964_v44 = vmul.f32 %v962_v18, %v962_v18 }
 0x6a1   : > { %v968_v40 = vsel %vm366_vm8, %v964_v44, 0.0 }
 0x6a2   : > { %969 = vadd.xlane.f32.xlu1 %v968_v40 }
 0x70d   : > { %v967_v0 = vpop.xlane.xlu1 %966 }
 0x70e   : > { %v971_v5 = vmul.f32 %v967_v0, %v2379_v59 }
 0x710   : > { %v973_v57 = vadd.f32 1e-12, %v971_v5 }
 0x712   : > { %1623 = vrsqrt.f32 %v973_v57  ;;  %vm981_vm15 = vweird.f32 %v973_v57 }
 0x715   : > { %v970_v60 = vpop.xlane.xlu1 %969 }
 0x716   : > { %v972_v3 = vmul.f32 %v970_v60, %v2379_v59 }
 0x718   : > { %v1624_v62 = vpop.eup %1623  ;;  %v974_v41 = vadd.f32 1e-12, %v972_v3  ;;  %v1447_v3 = vor.u32 %v2175_v54, %v2170_v53 }
 0x719   : > { %v976_v46 = vmul.f32 %v1624_v62, %v973_v57  ;;  %vm982_vm14 = vweird.f32 %v1624_v62 }
 0x71a   : > { %1625 = vrsqrt.f32 %v974_v41  ;;  %vm983_vm1 = vmor %vm981_vm15, %vm982_vm14  ;;  %vm991_vm3 = vweird.f32 %v974_v41  ;;  %1110 = vmatpush.bf16.msra.mxu2 %v1447_v3 }
 0x71b   : > { %v977_v43 = vmul.f32 %v1624_v62, %v976_v46  ;;  %v2537_v46 = vld [vmem:[#allocation28_spill] sm:$0xff] }
 0x71d   : > { %v978_v38 = vmul.f32 0.5, %v977_v43  ;;  %v2538_v43 = vld [vmem:[#allocation29_spill] sm:$0xff] }
 0x71f   : > { %v979_v1 = vsub.f32 1.5, %v978_v38  ;;  %v1431_v38 = vor.u32 %v2538_v43, %v2537_v46 }
 0x720   : > { %v1626_v42 = vpop.eup %1625 }
 0x721   : > { %v980_v56 = vmul.f32 %v1624_v62, %v979_v1  ;;  %v986_v19 = vmul.f32 %v1626_v42, %v974_v41  ;;  %vm992_vm2 = vweird.f32 %v1626_v42  ;;  %v2539_v1 = vld [vmem:[#allocation26_spill] sm:$0xff] }
 0x722   : > { %vm993_vm4 = vmor %vm991_vm3, %vm992_vm2 }
 0x723   : > { %v987_v61 = vmul.f32 %v1626_v42, %v986_v19  ;;  %v984_v39 = vsel %vm983_vm1, %v1624_v62, %v980_v56  ;;  %v2536_v62 = vld [vmem:[#allocation30_spill] sm:$0xff]  ;;  %v2541_v19 = vld [vmem:[#allocation24_spill] sm:$0xff] }
 0x724   : > { %v995_v40 = vmul.f32 %v984_v39, %v961_v63  ;;  %v1443_v63 = vor.u32 %v2165_v52, %v2160_v51  ;;  %v1435_v41 = vor.u32 %v2536_v62, %v2140_v47 }
 0x725   : > { %v988_v48 = vmul.f32 0.5, %v987_v61  ;;  %v2542_v61 = vld [vmem:[#allocation25_spill] sm:$0xff] }
 0x726   : > { %v997_v2 = vmul.f32 %v2069_v28, %v995_v40  ;;  %1111 = vmatpush.bf16.msra.mxu2 %v1443_v63  ;;  %v1423_v39 = vor.u32 %v2542_v61, %v2541_v19 }
 0x727   : > { %v989_v44 = vsub.f32 1.5, %v988_v48  ;;  %v2543_v48 = vld [vmem:[#allocation22_spill] sm:$0xff] }
 0x728   : > { %v999_v45 = vadd.f32 %v2074_v29, %v997_v2 }
 0x729   : > { %v990_v55 = vmul.f32 %v1626_v42, %v989_v44  ;;  %v2544_v44 = vld [vmem:[#allocation23_spill] sm:$0xff] }
 0x72a   : > { %v1419_v40 = vor.u32 %v2544_v44, %v2543_v48 }
 0x72b   : > { %v994_v4 = vsel %vm993_vm4, %v1626_v42, %v990_v55  ;;  %v2540_v42 = vld [vmem:[#allocation27_spill] sm:$0xff] }
 0x72c   : > { %v996_v0 = vmul.f32 %v994_v4, %v962_v18  ;;  %v1439_v18 = vor.u32 %v2155_v50, %v2150_v49  ;;  %v1427_v56 = vor.u32 %v2540_v42, %v2539_v1  ;;  %v2545_v4 = vld [vmem:[#allocation21_spill] sm:$0xff] }
 0x72e   : > { %v998_v5 = vmul.f32 %v2069_v28, %v996_v0  ;;  %1112 = vmatpush.bf16.msra.mxu2 %v1439_v18 }
 0x730   : > { %v1000_v57 = vadd.f32 %v2074_v29, %v998_v5 }
 0x732   : > { %v1001_v60 = vpack.c.bf16 %v1000_v57, %v999_v45  ;;  %1113 = vmatpush.bf16.msra.mxu2 %v1435_v41 }
 0x734   : > { %1415 = vmatmul.msk.bf16.vlgmr.msra.gmra.mxu1 %vm366_vm8, %v1001_v60 }
 0x736   : > { %1114 = vmatpush.bf16.msra.mxu2 %v1431_v38 }
 0x73a   : > { %1115 = vmatpush.bf16.msra.mxu2 %v1427_v56 }
 0x73e   : > { %1116 = vmatpush.bf16.msra.mxu2 %v1423_v39 }
 0x742   : > { %1117 = vmatpush.bf16.msra.mxu2 %v1419_v40 }
 0x7b1   : > { %v1038_v55 = vpop.f32.mrf.mxu1 }
 0x7b2   : > { %v1039_v2 = vadd.f32 %v2545_v4, %v1038_v55 }
 0x7b4   : > { %v1045_v0 = vmul.f32 0.044715, %v1039_v2  ;;  %v1043_v61 = vmul.f32 0.5, %v1039_v2 }
 0x7b6   : > { %v1047_v5 = vmul.f32 %v1045_v0, %v1039_v2 }
 0x7b8   : > { %v1049_v60 = vmul.f32 %v1047_v5, %v1039_v2  ;;  %v2546_v5 = vld [vmem:[#allocation31_spill] sm:$0xff] }
 0x7b9   : > { %v1040_v3 = vpop.f32.mrf.mxu1 }
 0x7ba   : > { %v1051_v63 = vadd.f32 %v1049_v60, %v1039_v2  ;;  %v1041_v18 = vadd.f32 %v2545_v4, %v1040_v3 }
 0x7bc   : > { %v1046_v62 = vmul.f32 0.044715, %v1041_v18  ;;  %v1053_v41 = vmul.f32 0.7978846, %v1051_v63  ;;  %v1044_v39 = vmul.f32 0.5, %v1041_v18 }
 0x7be   : > { %v1048_v46 = vmul.f32 %v1046_v62, %v1041_v18  ;;  %1627 = vtanh.f32 %v1053_v41 }
 0x7c0   : > { %v1050_v43 = vmul.f32 %v1048_v46, %v1041_v18 }
 0x7c2   : > { %v1052_v38 = vadd.f32 %v1050_v43, %v1041_v18 }
 0x7c4   : > { %v1054_v1 = vmul.f32 0.7978846, %v1052_v38  ;;  %v1628_v42 = vpop.eup %1627 }
 0x7c5   : > { %v1057_v56 = vadd.f32 1.0, %v1628_v42 }
 0x7c6   : > { %1629 = vtanh.f32 %v1054_v1 }
 0x7c7   : > { %v1059_v44 = vmul.f32 %v1057_v56, %v1043_v61 }
 0x7cc   : > { %v1630_v19 = vpop.eup %1629 }
 0x7cd   : > { %v1058_v48 = vadd.f32 1.0, %v1630_v19 }
 0x7cf   : > { %v1060_v40 = vmul.f32 %v1058_v48, %v1044_v39 }
 0x7d1   : > { %v1061_v55 = vpack.c.bf16 %v1060_v40, %v1059_v44 }
 0x7d3   : > { %1118 = vmatmul.bf16.vlgmr.msra.gmra.mxu2 %v1061_v55 }
 0x856   : > { %v1119_v0 = vpop.f32.mrf.mxu2 }
 0x857   : > { %v1120_v60 = vadd.f32 %v2546_v5, %v1119_v0 }
 0x859   : > { %v1124_v3 = vadd.f32 %v1120_v60, %v999_v45 }
 0x85b   : > { %v1126_v63 = vsel %vm366_vm8, %v1124_v3, 0.0 }
 0x85c   : > { %1127 = vadd.xlane.f32.xlu2 %v1126_v63 }
 0x85e   : > { %v1121_v62 = vpop.f32.mrf.mxu2 }
 0x85f   : > { %v1122_v41 = vadd.f32 %v2546_v5, %v1121_v62 }
 0x861   : > { %v1125_v46 = vadd.f32 %v1122_v41, %v1000_v57 }
 0x863   : > { %v1129_v43 = vsel %vm366_vm8, %v1125_v46, 0.0 }
 0x864   : > { %1130 = vadd.xlane.f32.xlu1 %v1129_v43 }
 0x8cf   : > { %v1128_v2 = vpop.xlane.xlu2 %1127 }
 0x8d0   : > { %v1132_v18 = vmul.f32 %v1128_v2, %v2379_v59 }
 0x8d2   : > { %v1134_v38 = vsub.f32 %v1124_v3, %v1132_v18 }
 0x8d4   : > { %v1136_v1 = vmul.f32 %v1134_v38, %v1134_v38 }
 0x8d6   : > { %v1138_v42 = vsel %vm366_vm8, %v1136_v1, 0.0 }
 0x8d7   : > { %v1131_v56 = vpop.xlane.xlu1 %1130  ;;  %1139 = vadd.xlane.f32.xlu1 %v1138_v42 }
 0x8d8   : > { %v1133_v45 = vmul.f32 %v1131_v56, %v2379_v59 }
 0x8da   : > { %v1135_v19 = vsub.f32 %v1125_v46, %v1133_v45  ;;  %v2547_v45 = vld [vmem:[#allocation32_spill] sm:$0xff] }
 0x8dc   : > { %v1137_v61 = vmul.f32 %v1135_v19, %v1135_v19 }
 0x8de   : > { %v1141_v39 = vsel %vm366_vm8, %v1137_v61, 0.0 }
 0x8df   : > { %1142 = vadd.xlane.f32.xlu1 %v1141_v39  ;;  %v2548_v39 = vld [vmem:[#allocation33_spill] sm:$0xff] }
 0x94a   : > { %v1140_v57 = vpop.xlane.xlu1 %1139 }
 0x94b   : > { %v1144_v48 = vmul.f32 %v1140_v57, %v2379_v59 }
 0x94d   : > { %v1146_v44 = vadd.f32 1e-12, %v1144_v48 }
 0x94f   : > { %1631 = vrsqrt.f32 %v1146_v44  ;;  %vm1154_vm6 = vweird.f32 %v1146_v44 }
 0x952   : > { %v1143_v40 = vpop.xlane.xlu1 %1142 }
 0x953   : > { %v1145_v55 = vmul.f32 %v1143_v40, %v2379_v59 }
 0x955   : > { %v1632_v0 = vpop.eup %1631  ;;  %v1147_v60 = vadd.f32 1e-12, %v1145_v55 }
 0x956   : > { %v1149_v3 = vmul.f32 %v1632_v0, %v1146_v44  ;;  %vm1155_vm5 = vweird.f32 %v1632_v0 }
 0x957   : > { %1633 = vrsqrt.f32 %v1147_v60  ;;  %vm1156_vm7 = vmor %vm1154_vm6, %vm1155_vm5  ;;  %vm1164_vm10 = vweird.f32 %v1147_v60 }
 0x958   : > { %v1150_v63 = vmul.f32 %v1632_v0, %v1149_v3 }
 0x95a   : > { %v1151_v62 = vmul.f32 0.5, %v1150_v63 }
 0x95c   : > { %v1152_v41 = vsub.f32 1.5, %v1151_v62 }
 0x95d   : > { %v1634_v46 = vpop.eup %1633 }
 0x95e   : > { %v1153_v43 = vmul.f32 %v1632_v0, %v1152_v41  ;;  %v1159_v2 = vmul.f32 %v1634_v46, %v1147_v60  ;;  %vm1165_vm9 = vweird.f32 %v1634_v46  ;;  %v1510_v60 = vld [vmem:[#allocation8 + $0x10] sm:$0xff] (%p319_p0) }
 0x95f   : > { %vm1166_vm11 = vmor %vm1164_vm10, %vm1165_vm9  ;;  %v1514_v41 = vld [vmem:[%s2482_s20 + $0x10] sm:$0xff] (%p319_p0) }
 0x960   : > { %v1157_v18 = vsel %vm1156_vm7, %v1632_v0, %v1153_v43  ;;  %v1160_v1 = vmul.f32 %v1634_v46, %v1159_v2 }
 0x961   : > { %v1168_v42 = vmul.f32 %v1157_v18, %v1134_v38  ;;  %v1511_v38 = vld [vmem:[#allocation8 + $0x18] sm:$0xff] (%p319_p0) }
 0x962   : > { %v1161_v56 = vmul.f32 0.5, %v1160_v1  ;;  %1228 = vmatpush.bf16.msra.mxu0 (%p319_p0), %v1511_v38 }
 0x963   : > { %v1170_v61 = vmul.f32 %v2547_v45, %v1168_v42 }
 0x964   : > { %v1162_v59 = vsub.f32 1.5, %v1161_v56 }
 0x965   : > { %v1172_v57 = vadd.f32 %v2548_v39, %v1170_v61  }
 0x966   : > { %v1163_v48 = vmul.f32 %v1634_v46, %v1162_v59  ;;  %1229 = vmatpush.bf16.msra.mxu0 (%p319_p0), %v1510_v60 }
 0x967   : > { %v2550_v59 = vmov %v1172_v57  ;;  %v1174_v63 = vpack.c.bf16 (%p319_p0), %v1172_v57, %v1172_v57 }
 0x968   : > { %v1167_v40 = vsel %vm1166_vm11, %v1634_v46, %v1163_v48  ;;  %v1509_v46 = vld [vmem:[#allocation8 + $0x8] sm:$0xff] (%p319_p0) }
 0x969   : > { %v1169_v55 = vmul.f32 %v1167_v40, %v1135_v19  ;;  %v1515_v19 = vld [vmem:[%s2482_s20 + $0x18] sm:$0xff] (%p319_p0)  ;;  %v1190_v43 = vunpack.c.l.b16 (%p319_p0), %v1174_v63 }
 0x96a   :  { %1282 = vmatpush.bf16.msra.mxu1 (%p319_p0), %v1515_v19  ;;  %1230 = vmatpush.bf16.msra.mxu0 (%p319_p0), %v1509_v46 }
 0x96b   : > { %v1171_v3 = vmul.f32 %v2547_v45, %v1169_v55  ;;  %321 = sbr.rel (!%p319_p0) target bundleno = 459 (0x1cb), region = 131 }
 0x96d   : > { %v1173_v44 = vadd.f32 %v2548_v39, %v1171_v3  }
 0x96e   :  { %1283 = vmatpush.bf16.msra.mxu1 (%p319_p0), %v1514_v41  ;;  %1231 = vmatpush.bf16.msra.mxu0 (%p319_p0), %v1508_v6 }
 0x96f   : > { %v2549_v61 = vmov %v1173_v44  ;;  %v1175_v0 = vpack.c.bf16 (%p319_p0), %v1173_v44, %v1173_v44 }
 0x971   :  { %v1191_v62 = vunpack.c.l.b16 %v1175_v0 }
 0x972   :  { %1284 = vmatpush.bf16.msra.mxu1 %v1513_v9 }
 0x973   :  { %v1192_v2 = vrot.slane %v1191_v62, 7 }
 0x975   :  { %v1194_v7 = vsel %vm1193_vm12, %v1192_v2, %v1190_v43 }
 0x976   :  { %v1195_v8 = vpack.c.b16 %v1194_v7, %v1194_v7  ;;  %1285 = vmatpush.bf16.msra.mxu1 %v1512_v10 }
 0x978   :  { %1464 = vmatmul.msk.bf16.vlgmr.msra.gmra.mxu0 %vm366_vm8, %v1195_v8 }
 0x9f5   :  { %v1233_v12 = vpop.f32.mrf.mxu0 }
 0x9f6   :  { %v1234_v13 = vadd.f32 %v1635_v11, %v1233_v12 }
 0x9f8   :  { %v1237_v14 = vmax.f32 %v1234_v13, 0.0 }
 0x9fa   :  { %v1238_v15 = vpack.c.bf16 %v1237_v14, %v1237_v14 }
 0x9fc   :  { %1481 = vmatmul.msk.bf16.vlgmr.msra.gmra.mxu1 %vm366_vm8, %v1238_v15 }
 0x9fd   :  { %v1235_v16 = vpop.f32.mrf.mxu0 }
 0xa79   :  { %v1287_v20 = vpop.f32.mrf.mxu1 }
 0xa7a   :  { %v1288_v21 = vadd.f32 %v1636_v17, %v1287_v20 }
 0xa7c   :  { %1292 = vst.msk [vmem:[#allocation10] sm:$0x3] %vm1291_vm0, %v1288_v21 }
 0xa7d   :  { %1303 = dma.vmem_to_hbm [thread:$0]  %s1299_s16, 32, %s1301_s4, [#allocation4]  }
 0xa81   :  { %v1289_v22 = vpop.f32.mrf.mxu1 }
 0xa82   :  { %1775 = dma.done.wait [#allocation4], 32  }
 0xa83   :  { %1776 = vsyncadd [#allocation4], 4294967264 }
 0xa84   :  { %1308 = vsyncpa [#allocation3], 1 }
 0xa85   :  { %1309 = vsyncpa [#allocation6], 1 }
 0xa86   :  { %1310 = vsyncpa [#allocation9], 1 }
 0xa87   :  { %1311 = vsyncpa [#allocation4], 1 }

</bundles_post_ra>
